<compile_context>
chip_gen: v6e
topology: v6e:2x2x1
jax: 0.10.0
libtpu: 0.0.40
codegen_flags: <defaults>
</compile_context>

<pallas_src>
import functools

import jax
import jax.numpy as jnp
import numpy as np
from jax import lax
from jax.experimental import pallas as pl
from jax.experimental.pallas import tpu as pltpu


# ---------------------------------------------------------------------------
# Pallas kernel: one grid step = BT batch elements, full forward pass.
# ---------------------------------------------------------------------------
def sound_classifier_kernel(x_ref, w1_ref, b1_ref, w2_ref, b2_ref, w3_ref, b3_ref,
                            wd1_ref, bd1_ref, wd2_ref, bd2_ref, o_ref,
                            a1p_ref, a2p_ref, a3_ref, flat_ref):
    bt, _, L = x_ref.shape
    f32 = jnp.float32
    cdt = w2_ref.dtype          # matmul compute dtype (bf16 by default, set by wrapper)

    # ---- conv1 (Cin=1): VPU broadcast multiply-add with time kept on lanes ----------
    x = x_ref[...]                                               # (BT, 1, L) f32
    zcol = jnp.zeros((bt, 1, 1), f32)
    x_prev = jnp.concatenate([zcol, x[:, :, :L - 1]], axis=2)    # x[t-1], 0 at t == 0
    x_next = jnp.concatenate([x[:, :, 1:], zcol], axis=2)        # x[t+1], 0 at t == L-1
    w1 = w1_ref[...]                                             # (3, 16, 1)
    y1 = (x_prev * w1[0][None] + x * w1[1][None] + x_next * w1[2][None]
          + b1_ref[...][None])                                   # (BT, 16, L)
    a1 = jnp.maximum(y1, 0.0)
    # the single layout transition: time moves from lanes to sublanes (rows = (b, t))
    a1p_ref[:, 2:L + 2, :] = jnp.transpose(a1, (0, 2, 1))        # (BT, L, 16)
    a1p_ref[:, 0:2, :] = jnp.zeros((bt, 2, 16), f32)             # zero halo rows
    a1p_ref[:, L + 2:L + 4, :] = jnp.zeros((bt, 2, 16), f32)

    def pooled_taps(ap_ref, n_out):
        """MaxPool1d(2,2) of the conv output in `ap_ref` (each batch element is padded
        with 2 zero rows on both sides) fused with prev/center/next tap extraction for
        the next kernel-size-3 conv.  Returns (BT, n_out, 3*C), taps stacked along K."""
        read = lambda s: ap_ref[:, pl.ds(s, n_out, stride=2), :]
        prev = jnp.maximum(read(0), read(1))
        cent = jnp.maximum(read(2), read(3))
        nxt = jnp.maximum(read(4), read(5))
        return jnp.concatenate([prev, cent, nxt], axis=2)

    # ---- pool1 + conv2 (16 -> 32): single (rows, 48) x (48, 32) MXU matmul -----------
    p1 = L // 2
    hcat1 = pooled_taps(a1p_ref, p1).reshape(bt * p1, 48)
    z2 = jnp.dot(hcat1.astype(cdt), w2_ref[...],
                 preferred_element_type=jnp.float32) + b2_ref[...]
    a2p_ref[:, 2:p1 + 2, :] = jnp.maximum(z2, 0.0).reshape(bt, p1, 32)
    a2p_ref[:, 0:2, :] = jnp.zeros((bt, 2, 32), f32)
    a2p_ref[:, p1 + 2:p1 + 4, :] = jnp.zeros((bt, 2, 32), f32)

    # ---- pool2 + conv3 (32 -> 64): single (rows, 96) x (96, 64) MXU matmul -----------
    p2 = L // 4
    hcat2 = pooled_taps(a2p_ref, p2).reshape(bt * p2, 96)
    z3 = jnp.dot(hcat2.astype(cdt), w3_ref[...],
                 preferred_element_type=jnp.float32) + b3_ref[...]
    a3_ref[...] = jnp.maximum(z3, 0.0).reshape(bt, p2, 64)

    # ---- pool3 + flatten, written directly into a lane-major (BT, fd*64) scratch -----
    fd = L // 8
    if fd <= 64:
        for t in range(fd):          # static unroll: one 64-lane column per pooled step
            flat_ref[:, t * 64:(t + 1) * 64] = jnp.maximum(a3_ref[:, 2 * t, :],
                                                           a3_ref[:, 2 * t + 1, :])
        flat = flat_ref[...]
    else:
        # TODO(synk): large-fd fallback uses a value relayout; verify/tune at target L.
        h3 = jnp.maximum(a3_ref[:, pl.ds(0, fd, stride=2), :],
                         a3_ref[:, pl.ds(1, fd, stride=2), :])
        flat = h3.reshape(bt, fd * 64)

    # ---- dense1 (fd*64 -> 128) + ReLU, dense2 (128 -> out_pad, lane-dense) -----------
    d1 = jnp.maximum(
        jnp.dot(flat.astype(cdt), wd1_ref[...],
                preferred_element_type=jnp.float32) + bd1_ref[...], 0.0)   # (BT, 128)
    out = jnp.dot(d1.astype(cdt), wd2_ref[...],
                  preferred_element_type=jnp.float32) + bd2_ref[...]       # (BT, out_pad)
    o_ref[:, 0, :] = out.astype(o_ref.dtype)


# ---------------------------------------------------------------------------
# Wrapper: batch-tile selection, parameter re-layout, pallas_call
# ---------------------------------------------------------------------------
_MAX_ROWS_PER_STEP = 16 * 1024     # bounds BT*L so the f32 activation scratches fit VMEM


def _choose_batch_tile(batch, seq_len, requested):
    bt = max(1, min(requested, max(1, _MAX_ROWS_PER_STEP // seq_len)))
    if batch >= 2:
        # keep >= 2 grid steps (megacore sharding / DMA-compute pipelining) and avoid
        # padding a tiny batch up to the tile size
        bt = min(bt, max(1, batch // 2))
    return max(1, bt)


@functools.partial(jax.jit, static_argnames=("batch_tile", "matmul_dtype"))
def sound_classifier_forward(x_ncl, params, *, batch_tile=256, matmul_dtype=jnp.bfloat16):
    """x_ncl: (B, 1, L) float32 (PyTorch NCL layout).  Returns (B, output_size)."""
    (w1, b1), (w2, b2), (w3, b3), (wd1, bd1), (wd2, bd2) = params
    B, _, L = x_ncl.shape
    assert L % 32 == 0, "sequence_length must be a multiple of 32 for this kernel"
    fd = L // 8
    out_size = wd2.shape[0]
    out_pad = pl.cdiv(out_size, 128) * 128            # lane-dense output width

    BT = _choose_batch_tile(B, L, batch_tile)
    B_pad = pl.cdiv(B, BT) * BT

    # --- glue: re-layout inputs / weights (plain JAX, outside the kernel) -------------
    x_k = x_ncl
    if B_pad != B:
        x_k = jnp.pad(x_k, ((0, B_pad - B), (0, 0), (0, 0)))     # (B_pad, 1, L)

    w1k = jnp.transpose(w1, (2, 0, 1))                           # (3, 16, 1) f32 (VPU)
    b1k = b1[:, None]                                            # (16, 1)
    # conv taps stacked along K (row index = k*Cin + i) so each conv is ONE matmul
    w2k = jnp.transpose(w2, (2, 1, 0)).reshape(3 * 16, 32).astype(matmul_dtype)
    w3k = jnp.transpose(w3, (2, 1, 0)).reshape(3 * 32, 64).astype(matmul_dtype)
    b2k, b3k = b2[None, :], b3[None, :]
    # fold PyTorch's channel-major flatten (j = c*fd + l) into dense-1's weight; the
    # kernel flattens time-major (j' = l*64 + c)
    wd1k = jnp.transpose(wd1.reshape(128, 64, fd), (2, 1, 0)).reshape(fd * 64, 128)
    wd1k = wd1k.astype(matmul_dtype)
    bd1k = bd1[None, :]
    wd2k = jnp.pad(wd2.T, ((0, 0), (0, out_pad - out_size))).astype(matmul_dtype)
    bd2k = jnp.pad(bd2, (0, out_pad - out_size))[None, :]

    full = lambda a: pl.BlockSpec(a.shape, lambda i, n=a.ndim: (0,) * n)

    flops = 2 * B_pad * (L * 3 * 16 + (L // 2) * 48 * 32 + (L // 4) * 96 * 64
                         + fd * 64 * 128 + 128 * out_pad)
    weight_ops = (w1k, b1k, w2k, b2k, w3k, b3k, wd1k, bd1k, wd2k, bd2k)
    bytes_accessed = (int(x_k.size) * 4 + B_pad * out_pad * 4
                      + sum(int(a.size) * a.dtype.itemsize for a in weight_ops))

    out = pl.pallas_call(
        sound_classifier_kernel,
        out_shape=jax.ShapeDtypeStruct((B_pad, 1, out_pad), jnp.float32),
        grid=(B_pad // BT,),
        in_specs=[
            pl.BlockSpec((BT, 1, L), lambda i: (i, 0, 0)),       # x, BT batch elements
            full(w1k), full(b1k), full(w2k), full(b2k),
            full(w3k), full(b3k), full(wd1k), full(bd1k),
            full(wd2k), full(bd2k),
        ],
        out_specs=pl.BlockSpec((BT, 1, out_pad), lambda i: (i, 0, 0)),
        scratch_shapes=[
            pltpu.VMEM((BT, L + 4, 16), jnp.float32),            # padded conv1 output
            pltpu.VMEM((BT, L // 2 + 4, 32), jnp.float32),       # padded conv2 output
            pltpu.VMEM((BT, L // 4, 64), jnp.float32),           # conv3 output
            pltpu.VMEM((BT, fd * 64), jnp.float32),              # flattened pooled conv3
        ],
        compiler_params=pltpu.CompilerParams(
            dimension_semantics=("parallel",),
            vmem_limit_bytes=48 * 1024 * 1024),
        cost_estimate=pl.CostEstimate(flops=flops, transcendentals=0,
                                      bytes_accessed=bytes_accessed),
    )(x_k, w1k, b1k, w2k, b2k, w3k, b3k, wd1k, bd1k, wd2k, bd2k)

    return out[:B, 0, :out_size]


# ---------------------------------------------------------------------------
# Pure-JAX reference (PyTorch semantics) for verification
# ---------------------------------------------------------------------------
def reference_forward(x_ncl, params):
    (w1, b1), (w2, b2), (w3, b3), (wd1, bd1), (wd2, bd2) = params

    def conv1d(x, w, b):       # x: (B, C, L), w: (O, I, 3)  (PyTorch layout)
        y = lax.conv_general_dilated(
            x, w, window_strides=(1,), padding=((1, 1),),
            dimension_numbers=("NCH", "OIH", "NCH"))
        return y + b[None, :, None]

    def pool(x):               # MaxPool1d(2, 2)
        B_, C_, L_ = x.shape
        return x.reshape(B_, C_, L_ // 2, 2).max(axis=-1)

    h = pool(jax.nn.relu(conv1d(x_ncl, w1, b1)))
    h = pool(jax.nn.relu(conv1d(h, w2, b2)))
    h = pool(jax.nn.relu(conv1d(h, w3, b3)))
    flat = h.reshape(h.shape[0], -1)                 # channel-major flatten
    d1 = jax.nn.relu(flat @ wd1.T + bd1)
    return d1 @ wd2.T + bd2


# ---------------------------------------------------------------------------
# Deterministic parameter construction (PyTorch-shaped, synthetic values)
# ---------------------------------------------------------------------------
def init_params(key, sequence_length, output_size):
    fd = sequence_length // 8

    def uniform(k, shape, fan_in):
        bound = 1.0 / np.sqrt(fan_in)
        return jax.random.uniform(k, shape, jnp.float32, -bound, bound)

    ks = jax.random.split(key, 10)
    w1 = uniform(ks[0], (16, 1, 3), 1 * 3);        b1 = uniform(ks[1], (16,), 1 * 3)
    w2 = uniform(ks[2], (32, 16, 3), 16 * 3);      b2 = uniform(ks[3], (32,), 16 * 3)
    w3 = uniform(ks[4], (64, 32, 3), 32 * 3);      b3 = uniform(ks[5], (64,), 32 * 3)
    wd1 = uniform(ks[6], (128, 64 * fd), 64 * fd); bd1 = uniform(ks[7], (128,), 64 * fd)
    wd2 = uniform(ks[8], (output_size, 128), 128); bd2 = uniform(ks[9], (output_size,), 128)
    return ((w1, b1), (w2, b2), (w3, b3), (wd1, bd1), (wd2, bd2))


if __name__ == "__main__":
    B = 2
    SEQUENCE_LENGTH = 64
    OUTPUT_SIZE = 10

    key = jax.random.PRNGKey(0)
    x_key, p_key = jax.random.split(key)
    x = jax.random.normal(x_key, (B, 1, SEQUENCE_LENGTH), dtype=jnp.float32)
    params = init_params(p_key, SEQUENCE_LENGTH, OUTPUT_SIZE)

    out = jax.block_until_ready(sound_classifier_forward(x, params))
    ref = jax.block_until_ready(reference_forward(x, params))

    assert out.shape == (B, OUTPUT_SIZE)
    # bf16 matmul operands (f32 accumulation) -> looser tolerance than a pure-f32 check
    np.testing.assert_allclose(np.asarray(out), np.asarray(ref), rtol=2e-2, atol=2e-2)

    print("KERNEL_OK")
</pallas_src>

<mosaic_0001>
module attributes {stable_mosaic.version = 11 : i64} {
  func.func @sound_classifier_kernel(%arg0: i32, %arg1: memref<1x1x64xf32, #tpu.memory_space<vmem>>, %arg2: memref<3x16x1xf32, #tpu.memory_space<vmem>>, %arg3: memref<16x1xf32, #tpu.memory_space<vmem>>, %arg4: memref<48x32xbf16, #tpu.memory_space<vmem>>, %arg5: memref<1x32xf32, #tpu.memory_space<vmem>>, %arg6: memref<96x64xbf16, #tpu.memory_space<vmem>>, %arg7: memref<1x64xf32, #tpu.memory_space<vmem>>, %arg8: memref<512x128xbf16, #tpu.memory_space<vmem>>, %arg9: memref<1x128xf32, #tpu.memory_space<vmem>>, %arg10: memref<128x128xbf16, #tpu.memory_space<vmem>>, %arg11: memref<1x128xf32, #tpu.memory_space<vmem>>, %arg12: memref<1x1x128xf32, #tpu.memory_space<vmem>>, %arg13: memref<1x68x16xf32, #tpu.memory_space<vmem>>, %arg14: memref<1x36x32xf32, #tpu.memory_space<vmem>>, %arg15: memref<1x16x64xf32, #tpu.memory_space<vmem>>, %arg16: memref<1x512xf32, #tpu.memory_space<vmem>>) attributes {dimension_semantics = [#tpu.dimension_semantics<parallel>], iteration_bounds = array<i64: 2>, scalar_prefetch = 0 : i64, scratch_operands = 4 : i64, tpu.core_type = #tpu.core_type<tc>, window_params = [{transform_indices = @transform_0, window_bounds = array<i64: 1, 1, 64>}, {pipeline_mode = #tpu.pipeline_mode<synchronous>, transform_indices = @transform_1, window_bounds = array<i64: 3, 16, 1>}, {pipeline_mode = #tpu.pipeline_mode<synchronous>, transform_indices = @transform_2, window_bounds = array<i64: 16, 1>}, {pipeline_mode = #tpu.pipeline_mode<synchronous>, transform_indices = @transform_3, window_bounds = array<i64: 48, 32>}, {pipeline_mode = #tpu.pipeline_mode<synchronous>, transform_indices = @transform_4, window_bounds = array<i64: 1, 32>}, {pipeline_mode = #tpu.pipeline_mode<synchronous>, transform_indices = @transform_5, window_bounds = array<i64: 96, 64>}, {pipeline_mode = #tpu.pipeline_mode<synchronous>, transform_indices = @transform_6, window_bounds = array<i64: 1, 64>}, {pipeline_mode = #tpu.pipeline_mode<synchronous>, transform_indices = @transform_7, window_bounds = array<i64: 512, 128>}, {pipeline_mode = #tpu.pipeline_mode<synchronous>, transform_indices = @transform_8, window_bounds = array<i64: 1, 128>}, {pipeline_mode = #tpu.pipeline_mode<synchronous>, transform_indices = @transform_9, window_bounds = array<i64: 128, 128>}, {pipeline_mode = #tpu.pipeline_mode<synchronous>, transform_indices = @transform_10, window_bounds = array<i64: 1, 128>}, {transform_indices = @transform_11, window_bounds = array<i64: 1, 1, 128>}]} {
    %c0 = arith.constant 0 : index
    %c0_0 = arith.constant 0 : index
    %c0_1 = arith.constant 0 : index
    %0 = vector.load %arg1[%c0, %c0_0, %c0_1] : memref<1x1x64xf32, #tpu.memory_space<vmem>>, vector<1x1x64xf32>
    %cst = arith.constant 0.000000e+00 : f32
    %1 = vector.broadcast %cst : f32 to vector<1x1x1xf32>
    %2 = vector.extract_strided_slice %0 {offsets = [0, 0, 0], sizes = [1, 1, 63], strides = [1, 1, 1]} : vector<1x1x64xf32> to vector<1x1x63xf32>
    %3 = tpu.concatenate %1, %2 in 2 : vector<1x1x1xf32>, vector<1x1x63xf32> -> vector<1x1x64xf32>
    %4 = vector.extract_strided_slice %0 {offsets = [0, 0, 1], sizes = [1, 1, 63], strides = [1, 1, 1]} : vector<1x1x64xf32> to vector<1x1x63xf32>
    %5 = tpu.concatenate %4, %1 in 2 : vector<1x1x63xf32>, vector<1x1x1xf32> -> vector<1x1x64xf32>
    %c0_2 = arith.constant 0 : index
    %c0_3 = arith.constant 0 : index
    %c0_4 = arith.constant 0 : index
    %6 = vector.load %arg2[%c0_2, %c0_3, %c0_4] : memref<3x16x1xf32, #tpu.memory_space<vmem>>, vector<3x16x1xf32>
    %7 = vector.extract_strided_slice %6 {offsets = [0, 0, 0], sizes = [1, 16, 1], strides = [1, 1, 1]} : vector<3x16x1xf32> to vector<1x16x1xf32>
    %8 = vector.shape_cast %7 : vector<1x16x1xf32> to vector<16x1xf32>
    %9 = vector.shape_cast %8 : vector<16x1xf32> to vector<1x16x1xf32>
    %10 = vector.broadcast %3 : vector<1x1x64xf32> to vector<1x16x64xf32>
    %11 = vector.broadcast %9 : vector<1x16x1xf32> to vector<1x16x64xf32>
    %12 = arith.mulf %10, %11 : vector<1x16x64xf32>
    %13 = vector.extract_strided_slice %6 {offsets = [1, 0, 0], sizes = [1, 16, 1], strides = [1, 1, 1]} : vector<3x16x1xf32> to vector<1x16x1xf32>
    %14 = vector.shape_cast %13 : vector<1x16x1xf32> to vector<16x1xf32>
    %15 = vector.shape_cast %14 : vector<16x1xf32> to vector<1x16x1xf32>
    %16 = vector.broadcast %0 : vector<1x1x64xf32> to vector<1x16x64xf32>
    %17 = vector.broadcast %15 : vector<1x16x1xf32> to vector<1x16x64xf32>
    %18 = arith.mulf %16, %17 : vector<1x16x64xf32>
    %19 = arith.addf %12, %18 : vector<1x16x64xf32>
    %20 = vector.extract_strided_slice %6 {offsets = [2, 0, 0], sizes = [1, 16, 1], strides = [1, 1, 1]} : vector<3x16x1xf32> to vector<1x16x1xf32>
    %21 = vector.shape_cast %20 : vector<1x16x1xf32> to vector<16x1xf32>
    %22 = vector.shape_cast %21 : vector<16x1xf32> to vector<1x16x1xf32>
    %23 = vector.broadcast %5 : vector<1x1x64xf32> to vector<1x16x64xf32>
    %24 = vector.broadcast %22 : vector<1x16x1xf32> to vector<1x16x64xf32>
    %25 = arith.mulf %23, %24 : vector<1x16x64xf32>
    %26 = arith.addf %19, %25 : vector<1x16x64xf32>
    %c0_5 = arith.constant 0 : index
    %c0_6 = arith.constant 0 : index
    %27 = vector.load %arg3[%c0_5, %c0_6] : memref<16x1xf32, #tpu.memory_space<vmem>>, vector<16x1xf32>
    %28 = vector.shape_cast %27 : vector<16x1xf32> to vector<1x16x1xf32>
    %29 = vector.broadcast %28 : vector<1x16x1xf32> to vector<1x16x64xf32>
    %30 = arith.addf %26, %29 : vector<1x16x64xf32>
    %cst_7 = arith.constant 0.000000e+00 : f32
    %31 = vector.broadcast %cst_7 : f32 to vector<1x16x64xf32>
    %32 = arith.maximumf %30, %31 : vector<1x16x64xf32>
    %33 = tpu.transpose %32, [0, 2, 1] : vector<1x16x64xf32> -> vector<1x64x16xf32>
    %c0_8 = arith.constant 0 : index
    %c2 = arith.constant 2 : index
    %c0_9 = arith.constant 0 : index
    %34 = vector.load %arg13[%c0_8, %c2, %c0_9] : memref<1x68x16xf32, #tpu.memory_space<vmem>>, vector<1x64x16xf32>
    tpu.vector_store %arg13[%c0_8, %c2, %c0_9], %33 {strides = array<i32>} : memref<1x68x16xf32, #tpu.memory_space<vmem>>, vector<1x64x16xf32>,
    %cst_10 = arith.constant 0.000000e+00 : f32
    %35 = vector.broadcast %cst_10 : f32 to vector<1x2x16xf32>
    %c0_11 = arith.constant 0 : index
    %c0_12 = arith.constant 0 : index
    %c0_13 = arith.constant 0 : index
    %36 = vector.load %arg13[%c0_11, %c0_12, %c0_13] : memref<1x68x16xf32, #tpu.memory_space<vmem>>, vector<1x2x16xf32>
    tpu.vector_store %arg13[%c0_11, %c0_12, %c0_13], %35 {strides = array<i32>} : memref<1x68x16xf32, #tpu.memory_space<vmem>>, vector<1x2x16xf32>,
    %cst_14 = arith.constant 0.000000e+00 : f32
    %37 = vector.broadcast %cst_14 : f32 to vector<1x2x16xf32>
    %c0_15 = arith.constant 0 : index
    %c66 = arith.constant 66 : index
    %c0_16 = arith.constant 0 : index
    %38 = vector.load %arg13[%c0_15, %c66, %c0_16] : memref<1x68x16xf32, #tpu.memory_space<vmem>>, vector<1x2x16xf32>
    tpu.vector_store %arg13[%c0_15, %c66, %c0_16], %37 {strides = array<i32>} : memref<1x68x16xf32, #tpu.memory_space<vmem>>, vector<1x2x16xf32>,
    %c0_17 = arith.constant 0 : index
    %c0_18 = arith.constant 0 : index
    %c0_19 = arith.constant 0 : index
    %39 = tpu.strided_load %arg13[%c0_17, %c0_18, %c0_19] {strides = array<i32: 1, 2, 1>} : memref<1x68x16xf32, #tpu.memory_space<vmem>>, vector<1x32x16xf32>
    %c0_20 = arith.constant 0 : index
    %c1 = arith.constant 1 : index
    %c0_21 = arith.constant 0 : index
    %40 = tpu.strided_load %arg13[%c0_20, %c1, %c0_21] {strides = array<i32: 1, 2, 1>} : memref<1x68x16xf32, #tpu.memory_space<vmem>>, vector<1x32x16xf32>
    %41 = arith.maximumf %39, %40 : vector<1x32x16xf32>
    %c0_22 = arith.constant 0 : index
    %c2_23 = arith.constant 2 : index
    %c0_24 = arith.constant 0 : index
    %42 = tpu.strided_load %arg13[%c0_22, %c2_23, %c0_24] {strides = array<i32: 1, 2, 1>} : memref<1x68x16xf32, #tpu.memory_space<vmem>>, vector<1x32x16xf32>
    %c0_25 = arith.constant 0 : index
    %c3 = arith.constant 3 : index
    %c0_26 = arith.constant 0 : index
    %43 = tpu.strided_load %arg13[%c0_25, %c3, %c0_26] {strides = array<i32: 1, 2, 1>} : memref<1x68x16xf32, #tpu.memory_space<vmem>>, vector<1x32x16xf32>
    %44 = arith.maximumf %42, %43 : vector<1x32x16xf32>
    %c0_27 = arith.constant 0 : index
    %c4 = arith.constant 4 : index
    %c0_28 = arith.constant 0 : index
    %45 = tpu.strided_load %arg13[%c0_27, %c4, %c0_28] {strides = array<i32: 1, 2, 1>} : memref<1x68x16xf32, #tpu.memory_space<vmem>>, vector<1x32x16xf32>
    %c0_29 = arith.constant 0 : index
    %c5 = arith.constant 5 : index
    %c0_30 = arith.constant 0 : index
    %46 = tpu.strided_load %arg13[%c0_29, %c5, %c0_30] {strides = array<i32: 1, 2, 1>} : memref<1x68x16xf32, #tpu.memory_space<vmem>>, vector<1x32x16xf32>
    %47 = arith.maximumf %45, %46 : vector<1x32x16xf32>
    %48 = tpu.concatenate %41, %44, %47 in 2 : vector<1x32x16xf32>, vector<1x32x16xf32>, vector<1x32x16xf32> -> vector<1x32x48xf32>
    %49 = vector.shape_cast %48 : vector<1x32x48xf32> to vector<32x48xf32>
    %50 = arith.truncf %49 : vector<32x48xf32> to vector<32x48xbf16>
    %c0_31 = arith.constant 0 : index
    %c0_32 = arith.constant 0 : index
    %51 = vector.load %arg4[%c0_31, %c0_32] : memref<48x32xbf16, #tpu.memory_space<vmem>>, vector<48x32xbf16>
    %cst_33 = arith.constant dense<0.000000e+00> : vector<32x32xf32>
    %52 = tpu.matmul %50, %51, %cst_33 {dimension_numbers = #tpu.dot_dimension_numbers<[1], [0], [0], [1], [0, 0, 1, 1], [], []>} : vector<32x48xbf16>, vector<48x32xbf16>, vector<32x32xf32> -> vector<32x32xf32>
    %c0_34 = arith.constant 0 : index
    %c0_35 = arith.constant 0 : index
    %53 = vector.load %arg5[%c0_34, %c0_35] : memref<1x32xf32, #tpu.memory_space<vmem>>, vector<1x32xf32>
    %54 = vector.broadcast %53 : vector<1x32xf32> to vector<32x32xf32>
    %55 = arith.addf %52, %54 : vector<32x32xf32>
    %cst_36 = arith.constant 0.000000e+00 : f32
    %56 = vector.broadcast %cst_36 : f32 to vector<32x32xf32>
    %57 = arith.maximumf %55, %56 : vector<32x32xf32>
    %58 = vector.shape_cast %57 : vector<32x32xf32> to vector<1x32x32xf32>
    %c0_37 = arith.constant 0 : index
    %c2_38 = arith.constant 2 : index
    %c0_39 = arith.constant 0 : index
    %59 = vector.load %arg14[%c0_37, %c2_38, %c0_39] : memref<1x36x32xf32, #tpu.memory_space<vmem>>, vector<1x32x32xf32>
    tpu.vector_store %arg14[%c0_37, %c2_38, %c0_39], %58 {strides = array<i32>} : memref<1x36x32xf32, #tpu.memory_space<vmem>>, vector<1x32x32xf32>,
    %cst_40 = arith.constant 0.000000e+00 : f32
    %60 = vector.broadcast %cst_40 : f32 to vector<1x2x32xf32>
    %c0_41 = arith.constant 0 : index
    %c0_42 = arith.constant 0 : index
    %c0_43 = arith.constant 0 : index
    %61 = vector.load %arg14[%c0_41, %c0_42, %c0_43] : memref<1x36x32xf32, #tpu.memory_space<vmem>>, vector<1x2x32xf32>
    tpu.vector_store %arg14[%c0_41, %c0_42, %c0_43], %60 {strides = array<i32>} : memref<1x36x32xf32, #tpu.memory_space<vmem>>, vector<1x2x32xf32>,
    %cst_44 = arith.constant 0.000000e+00 : f32
    %62 = vector.broadcast %cst_44 : f32 to vector<1x2x32xf32>
    %c0_45 = arith.constant 0 : index
    %c34 = arith.constant 34 : index
    %c0_46 = arith.constant 0 : index
    %63 = vector.load %arg14[%c0_45, %c34, %c0_46] : memref<1x36x32xf32, #tpu.memory_space<vmem>>, vector<1x2x32xf32>
    tpu.vector_store %arg14[%c0_45, %c34, %c0_46], %62 {strides = array<i32>} : memref<1x36x32xf32, #tpu.memory_space<vmem>>, vector<1x2x32xf32>,
    %c0_47 = arith.constant 0 : index
    %c0_48 = arith.constant 0 : index
    %c0_49 = arith.constant 0 : index
    %64 = tpu.strided_load %arg14[%c0_47, %c0_48, %c0_49] {strides = array<i32: 1, 2, 1>} : memref<1x36x32xf32, #tpu.memory_space<vmem>>, vector<1x16x32xf32>
    %c0_50 = arith.constant 0 : index
    %c1_51 = arith.constant 1 : index
    %c0_52 = arith.constant 0 : index
    %65 = tpu.strided_load %arg14[%c0_50, %c1_51, %c0_52] {strides = array<i32: 1, 2, 1>} : memref<1x36x32xf32, #tpu.memory_space<vmem>>, vector<1x16x32xf32>
    %66 = arith.maximumf %64, %65 : vector<1x16x32xf32>
    %c0_53 = arith.constant 0 : index
    %c2_54 = arith.constant 2 : index
    %c0_55 = arith.constant 0 : index
    %67 = tpu.strided_load %arg14[%c0_53, %c2_54, %c0_55] {strides = array<i32: 1, 2, 1>} : memref<1x36x32xf32, #tpu.memory_space<vmem>>, vector<1x16x32xf32>
    %c0_56 = arith.constant 0 : index
    %c3_57 = arith.constant 3 : index
    %c0_58 = arith.constant 0 : index
    %68 = tpu.strided_load %arg14[%c0_56, %c3_57, %c0_58] {strides = array<i32: 1, 2, 1>} : memref<1x36x32xf32, #tpu.memory_space<vmem>>, vector<1x16x32xf32>
    %69 = arith.maximumf %67, %68 : vector<1x16x32xf32>
    %c0_59 = arith.constant 0 : index
    %c4_60 = arith.constant 4 : index
    %c0_61 = arith.constant 0 : index
    %70 = tpu.strided_load %arg14[%c0_59, %c4_60, %c0_61] {strides = array<i32: 1, 2, 1>} : memref<1x36x32xf32, #tpu.memory_space<vmem>>, vector<1x16x32xf32>
    %c0_62 = arith.constant 0 : index
    %c5_63 = arith.constant 5 : index
    %c0_64 = arith.constant 0 : index
    %71 = tpu.strided_load %arg14[%c0_62, %c5_63, %c0_64] {strides = array<i32: 1, 2, 1>} : memref<1x36x32xf32, #tpu.memory_space<vmem>>, vector<1x16x32xf32>
    %72 = arith.maximumf %70, %71 : vector<1x16x32xf32>
    %73 = tpu.concatenate %66, %69, %72 in 2 : vector<1x16x32xf32>, vector<1x16x32xf32>, vector<1x16x32xf32> -> vector<1x16x96xf32>
    %74 = vector.shape_cast %73 : vector<1x16x96xf32> to vector<16x96xf32>
    %75 = arith.truncf %74 : vector<16x96xf32> to vector<16x96xbf16>
    %c0_65 = arith.constant 0 : index
    %c0_66 = arith.constant 0 : index
    %76 = vector.load %arg6[%c0_65, %c0_66] : memref<96x64xbf16, #tpu.memory_space<vmem>>, vector<96x64xbf16>
    %cst_67 = arith.constant dense<0.000000e+00> : vector<16x64xf32>
    %77 = tpu.matmul %75, %76, %cst_67 {dimension_numbers = #tpu.dot_dimension_numbers<[1], [0], [0], [1], [0, 0, 1, 1], [], []>} : vector<16x96xbf16>, vector<96x64xbf16>, vector<16x64xf32> -> vector<16x64xf32>
    %c0_68 = arith.constant 0 : index
    %c0_69 = arith.constant 0 : index
    %78 = vector.load %arg7[%c0_68, %c0_69] : memref<1x64xf32, #tpu.memory_space<vmem>>, vector<1x64xf32>
    %79 = vector.broadcast %78 : vector<1x64xf32> to vector<16x64xf32>
    %80 = arith.addf %77, %79 : vector<16x64xf32>
    %cst_70 = arith.constant 0.000000e+00 : f32
    %81 = vector.broadcast %cst_70 : f32 to vector<16x64xf32>
    %82 = arith.maximumf %80, %81 : vector<16x64xf32>
    %83 = vector.shape_cast %82 : vector<16x64xf32> to vector<1x16x64xf32>
    %c0_71 = arith.constant 0 : index
    %c0_72 = arith.constant 0 : index
    %c0_73 = arith.constant 0 : index
    %84 = vector.load %arg15[%c0_71, %c0_72, %c0_73] : memref<1x16x64xf32, #tpu.memory_space<vmem>>, vector<1x16x64xf32>
    tpu.vector_store %arg15[%c0_71, %c0_72, %c0_73], %83 {strides = array<i32>} : memref<1x16x64xf32, #tpu.memory_space<vmem>>, vector<1x16x64xf32>,
    %c0_74 = arith.constant 0 : index
    %c0_75 = arith.constant 0 : index
    %c0_76 = arith.constant 0 : index
    %85 = vector.load %arg15[%c0_74, %c0_75, %c0_76] : memref<1x16x64xf32, #tpu.memory_space<vmem>>, vector<1x1x64xf32>
    %86 = vector.shape_cast %85 : vector<1x1x64xf32> to vector<1x64xf32>
    %c0_77 = arith.constant 0 : index
    %c1_78 = arith.constant 1 : index
    %c0_79 = arith.constant 0 : index
    %87 = vector.load %arg15[%c0_77, %c1_78, %c0_79] : memref<1x16x64xf32, #tpu.memory_space<vmem>>, vector<1x1x64xf32>
    %88 = vector.shape_cast %87 : vector<1x1x64xf32> to vector<1x64xf32>
    %89 = arith.maximumf %86, %88 : vector<1x64xf32>
    %c0_80 = arith.constant 0 : index
    %c0_81 = arith.constant 0 : index
    %90 = vector.load %arg16[%c0_80, %c0_81] : memref<1x512xf32, #tpu.memory_space<vmem>>, vector<1x64xf32>
    tpu.vector_store %arg16[%c0_80, %c0_81], %89 {strides = array<i32>} : memref<1x512xf32, #tpu.memory_space<vmem>>, vector<1x64xf32>,
    %c0_82 = arith.constant 0 : index
    %c2_83 = arith.constant 2 : index
    %c0_84 = arith.constant 0 : index
    %91 = vector.load %arg15[%c0_82, %c2_83, %c0_84] : memref<1x16x64xf32, #tpu.memory_space<vmem>>, vector<1x1x64xf32>
    %92 = vector.shape_cast %91 : vector<1x1x64xf32> to vector<1x64xf32>
    %c0_85 = arith.constant 0 : index
    %c3_86 = arith.constant 3 : index
    %c0_87 = arith.constant 0 : index
    %93 = vector.load %arg15[%c0_85, %c3_86, %c0_87] : memref<1x16x64xf32, #tpu.memory_space<vmem>>, vector<1x1x64xf32>
    %94 = vector.shape_cast %93 : vector<1x1x64xf32> to vector<1x64xf32>
    %95 = arith.maximumf %92, %94 : vector<1x64xf32>
    %c0_88 = arith.constant 0 : index
    %c64 = arith.constant 64 : index
    %96 = vector.load %arg16[%c0_88, %c64] : memref<1x512xf32, #tpu.memory_space<vmem>>, vector<1x64xf32>
    tpu.vector_store %arg16[%c0_88, %c64], %95 {strides = array<i32>} : memref<1x512xf32, #tpu.memory_space<vmem>>, vector<1x64xf32>,
    %c0_89 = arith.constant 0 : index
    %c4_90 = arith.constant 4 : index
    %c0_91 = arith.constant 0 : index
    %97 = vector.load %arg15[%c0_89, %c4_90, %c0_91] : memref<1x16x64xf32, #tpu.memory_space<vmem>>, vector<1x1x64xf32>
    %98 = vector.shape_cast %97 : vector<1x1x64xf32> to vector<1x64xf32>
    %c0_92 = arith.constant 0 : index
    %c5_93 = arith.constant 5 : index
    %c0_94 = arith.constant 0 : index
    %99 = vector.load %arg15[%c0_92, %c5_93, %c0_94] : memref<1x16x64xf32, #tpu.memory_space<vmem>>, vector<1x1x64xf32>
    %100 = vector.shape_cast %99 : vector<1x1x64xf32> to vector<1x64xf32>
    %101 = arith.maximumf %98, %100 : vector<1x64xf32>
    %c0_95 = arith.constant 0 : index
    %c128 = arith.constant 128 : index
    %102 = vector.load %arg16[%c0_95, %c128] : memref<1x512xf32, #tpu.memory_space<vmem>>, vector<1x64xf32>
    tpu.vector_store %arg16[%c0_95, %c128], %101 {strides = array<i32>} : memref<1x512xf32, #tpu.memory_space<vmem>>, vector<1x64xf32>,
    %c0_96 = arith.constant 0 : index
    %c6 = arith.constant 6 : index
    %c0_97 = arith.constant 0 : index
    %103 = vector.load %arg15[%c0_96, %c6, %c0_97] : memref<1x16x64xf32, #tpu.memory_space<vmem>>, vector<1x1x64xf32>
    %104 = vector.shape_cast %103 : vector<1x1x64xf32> to vector<1x64xf32>
    %c0_98 = arith.constant 0 : index
    %c7 = arith.constant 7 : index
    %c0_99 = arith.constant 0 : index
    %105 = vector.load %arg15[%c0_98, %c7, %c0_99] : memref<1x16x64xf32, #tpu.memory_space<vmem>>, vector<1x1x64xf32>
    %106 = vector.shape_cast %105 : vector<1x1x64xf32> to vector<1x64xf32>
    %107 = arith.maximumf %104, %106 : vector<1x64xf32>
    %c0_100 = arith.constant 0 : index
    %c192 = arith.constant 192 : index
    %108 = vector.load %arg16[%c0_100, %c192] : memref<1x512xf32, #tpu.memory_space<vmem>>, vector<1x64xf32>
    tpu.vector_store %arg16[%c0_100, %c192], %107 {strides = array<i32>} : memref<1x512xf32, #tpu.memory_space<vmem>>, vector<1x64xf32>,
    %c0_101 = arith.constant 0 : index
    %c8 = arith.constant 8 : index
    %c0_102 = arith.constant 0 : index
    %109 = vector.load %arg15[%c0_101, %c8, %c0_102] : memref<1x16x64xf32, #tpu.memory_space<vmem>>, vector<1x1x64xf32>
    %110 = vector.shape_cast %109 : vector<1x1x64xf32> to vector<1x64xf32>
    %c0_103 = arith.constant 0 : index
    %c9 = arith.constant 9 : index
    %c0_104 = arith.constant 0 : index
    %111 = vector.load %arg15[%c0_103, %c9, %c0_104] : memref<1x16x64xf32, #tpu.memory_space<vmem>>, vector<1x1x64xf32>
    %112 = vector.shape_cast %111 : vector<1x1x64xf32> to vector<1x64xf32>
    %113 = arith.maximumf %110, %112 : vector<1x64xf32>
    %c0_105 = arith.constant 0 : index
    %c256 = arith.constant 256 : index
    %114 = vector.load %arg16[%c0_105, %c256] : memref<1x512xf32, #tpu.memory_space<vmem>>, vector<1x64xf32>
    tpu.vector_store %arg16[%c0_105, %c256], %113 {strides = array<i32>} : memref<1x512xf32, #tpu.memory_space<vmem>>, vector<1x64xf32>,
    %c0_106 = arith.constant 0 : index
    %c10 = arith.constant 10 : index
    %c0_107 = arith.constant 0 : index
    %115 = vector.load %arg15[%c0_106, %c10, %c0_107] : memref<1x16x64xf32, #tpu.memory_space<vmem>>, vector<1x1x64xf32>
    %116 = vector.shape_cast %115 : vector<1x1x64xf32> to vector<1x64xf32>
    %c0_108 = arith.constant 0 : index
    %c11 = arith.constant 11 : index
    %c0_109 = arith.constant 0 : index
    %117 = vector.load %arg15[%c0_108, %c11, %c0_109] : memref<1x16x64xf32, #tpu.memory_space<vmem>>, vector<1x1x64xf32>
    %118 = vector.shape_cast %117 : vector<1x1x64xf32> to vector<1x64xf32>
    %119 = arith.maximumf %116, %118 : vector<1x64xf32>
    %c0_110 = arith.constant 0 : index
    %c320 = arith.constant 320 : index
    %120 = vector.load %arg16[%c0_110, %c320] : memref<1x512xf32, #tpu.memory_space<vmem>>, vector<1x64xf32>
    tpu.vector_store %arg16[%c0_110, %c320], %119 {strides = array<i32>} : memref<1x512xf32, #tpu.memory_space<vmem>>, vector<1x64xf32>,
    %c0_111 = arith.constant 0 : index
    %c12 = arith.constant 12 : index
    %c0_112 = arith.constant 0 : index
    %121 = vector.load %arg15[%c0_111, %c12, %c0_112] : memref<1x16x64xf32, #tpu.memory_space<vmem>>, vector<1x1x64xf32>
    %122 = vector.shape_cast %121 : vector<1x1x64xf32> to vector<1x64xf32>
    %c0_113 = arith.constant 0 : index
    %c13 = arith.constant 13 : index
    %c0_114 = arith.constant 0 : index
    %123 = vector.load %arg15[%c0_113, %c13, %c0_114] : memref<1x16x64xf32, #tpu.memory_space<vmem>>, vector<1x1x64xf32>
    %124 = vector.shape_cast %123 : vector<1x1x64xf32> to vector<1x64xf32>
    %125 = arith.maximumf %122, %124 : vector<1x64xf32>
    %c0_115 = arith.constant 0 : index
    %c384 = arith.constant 384 : index
    %126 = vector.load %arg16[%c0_115, %c384] : memref<1x512xf32, #tpu.memory_space<vmem>>, vector<1x64xf32>
    tpu.vector_store %arg16[%c0_115, %c384], %125 {strides = array<i32>} : memref<1x512xf32, #tpu.memory_space<vmem>>, vector<1x64xf32>,
    %c0_116 = arith.constant 0 : index
    %c14 = arith.constant 14 : index
    %c0_117 = arith.constant 0 : index
    %127 = vector.load %arg15[%c0_116, %c14, %c0_117] : memref<1x16x64xf32, #tpu.memory_space<vmem>>, vector<1x1x64xf32>
    %128 = vector.shape_cast %127 : vector<1x1x64xf32> to vector<1x64xf32>
    %c0_118 = arith.constant 0 : index
    %c15 = arith.constant 15 : index
    %c0_119 = arith.constant 0 : index
    %129 = vector.load %arg15[%c0_118, %c15, %c0_119] : memref<1x16x64xf32, #tpu.memory_space<vmem>>, vector<1x1x64xf32>
    %130 = vector.shape_cast %129 : vector<1x1x64xf32> to vector<1x64xf32>
    %131 = arith.maximumf %128, %130 : vector<1x64xf32>
    %c0_120 = arith.constant 0 : index
    %c448 = arith.constant 448 : index
    %132 = vector.load %arg16[%c0_120, %c448] : memref<1x512xf32, #tpu.memory_space<vmem>>, vector<1x64xf32>
    tpu.vector_store %arg16[%c0_120, %c448], %131 {strides = array<i32>} : memref<1x512xf32, #tpu.memory_space<vmem>>, vector<1x64xf32>,
    %c0_121 = arith.constant 0 : index
    %c0_122 = arith.constant 0 : index
    %133 = vector.load %arg16[%c0_121, %c0_122] : memref<1x512xf32, #tpu.memory_space<vmem>>, vector<1x512xf32>
    %134 = arith.truncf %133 : vector<1x512xf32> to vector<1x512xbf16>
    %c0_123 = arith.constant 0 : index
    %c0_124 = arith.constant 0 : index
    %135 = vector.load %arg8[%c0_123, %c0_124] : memref<512x128xbf16, #tpu.memory_space<vmem>>, vector<512x128xbf16>
    %cst_125 = arith.constant dense<0.000000e+00> : vector<1x128xf32>
    %136 = tpu.matmul %134, %135, %cst_125 {dimension_numbers = #tpu.dot_dimension_numbers<[1], [0], [0], [1], [0, 0, 1, 1], [], []>} : vector<1x512xbf16>, vector<512x128xbf16>, vector<1x128xf32> -> vector<1x128xf32>
    %c0_126 = arith.constant 0 : index
    %c0_127 = arith.constant 0 : index
    %137 = vector.load %arg9[%c0_126, %c0_127] : memref<1x128xf32, #tpu.memory_space<vmem>>, vector<1x128xf32>
    %138 = arith.addf %136, %137 : vector<1x128xf32>
    %cst_128 = arith.constant 0.000000e+00 : f32
    %139 = vector.broadcast %cst_128 : f32 to vector<1x128xf32>
    %140 = arith.maximumf %138, %139 : vector<1x128xf32>
    %141 = arith.truncf %140 : vector<1x128xf32> to vector<1x128xbf16>
    %c0_129 = arith.constant 0 : index
    %c0_130 = arith.constant 0 : index
    %142 = vector.load %arg10[%c0_129, %c0_130] : memref<128x128xbf16, #tpu.memory_space<vmem>>, vector<128x128xbf16>
    %cst_131 = arith.constant dense<0.000000e+00> : vector<1x128xf32>
    %143 = tpu.matmul %141, %142, %cst_131 {dimension_numbers = #tpu.dot_dimension_numbers<[1], [0], [0], [1], [0, 0, 1, 1], [], []>} : vector<1x128xbf16>, vector<128x128xbf16>, vector<1x128xf32> -> vector<1x128xf32>
    %c0_132 = arith.constant 0 : index
    %c0_133 = arith.constant 0 : index
    %144 = vector.load %arg11[%c0_132, %c0_133] : memref<1x128xf32, #tpu.memory_space<vmem>>, vector<1x128xf32>
    %145 = arith.addf %143, %144 : vector<1x128xf32>
    %c0_134 = arith.constant 0 : index
    %c0_135 = arith.constant 0 : index
    %c0_136 = arith.constant 0 : index
    %146 = vector.load %arg12[%c0_134, %c0_135, %c0_136] : memref<1x1x128xf32, #tpu.memory_space<vmem>>, vector<1x1x128xf32>
    %147 = vector.shape_cast %146 : vector<1x1x128xf32> to vector<1x128xf32>
    %148 = vector.shape_cast %145 : vector<1x128xf32> to vector<1x1x128xf32>
    tpu.vector_store %arg12[%c0_134, %c0_135, %c0_136], %148 {strides = array<i32>} : memref<1x1x128xf32, #tpu.memory_space<vmem>>, vector<1x1x128xf32>,
    return
  }
  func.func @transform_0(%arg0: i32) -> (i32, i32, i32) {
    %c0_i32 = arith.constant 0 : i32
    %c0_i32_0 = arith.constant 0 : i32
    %c0_i32_1 = arith.constant 0 : i32
    return %arg0, %c0_i32, %c0_i32_0 : i32, i32, i32
  }
  func.func @transform_1(%arg0: i32) -> (i32, i32, i32) {
    %c0_i32 = arith.constant 0 : i32
    %c0_i32_0 = arith.constant 0 : i32
    %c0_i32_1 = arith.constant 0 : i32
    %c0_i32_2 = arith.constant 0 : i32
    return %c0_i32, %c0_i32_0, %c0_i32_1 : i32, i32, i32
  }
  func.func @transform_2(%arg0: i32) -> (i32, i32) {
    %c0_i32 = arith.constant 0 : i32
    %c0_i32_0 = arith.constant 0 : i32
    %c0_i32_1 = arith.constant 0 : i32
    return %c0_i32, %c0_i32_0 : i32, i32
  }
  func.func @transform_3(%arg0: i32) -> (i32, i32) {
    %c0_i32 = arith.constant 0 : i32
    %c0_i32_0 = arith.constant 0 : i32
    %c0_i32_1 = arith.constant 0 : i32
    return %c0_i32, %c0_i32_0 : i32, i32
  }
  func.func @transform_4(%arg0: i32) -> (i32, i32) {
    %c0_i32 = arith.constant 0 : i32
    %c0_i32_0 = arith.constant 0 : i32
    %c0_i32_1 = arith.constant 0 : i32
    return %c0_i32, %c0_i32_0 : i32, i32
  }
  func.func @transform_5(%arg0: i32) -> (i32, i32) {
    %c0_i32 = arith.constant 0 : i32
    %c0_i32_0 = arith.constant 0 : i32
    %c0_i32_1 = arith.constant 0 : i32
    return %c0_i32, %c0_i32_0 : i32, i32
  }
  func.func @transform_6(%arg0: i32) -> (i32, i32) {
    %c0_i32 = arith.constant 0 : i32
    %c0_i32_0 = arith.constant 0 : i32
    %c0_i32_1 = arith.constant 0 : i32
    return %c0_i32, %c0_i32_0 : i32, i32
  }
  func.func @transform_7(%arg0: i32) -> (i32, i32) {
    %c0_i32 = arith.constant 0 : i32
    %c0_i32_0 = arith.constant 0 : i32
    %c0_i32_1 = arith.constant 0 : i32
    return %c0_i32, %c0_i32_0 : i32, i32
  }
  func.func @transform_8(%arg0: i32) -> (i32, i32) {
    %c0_i32 = arith.constant 0 : i32
    %c0_i32_0 = arith.constant 0 : i32
    %c0_i32_1 = arith.constant 0 : i32
    return %c0_i32, %c0_i32_0 : i32, i32
  }
  func.func @transform_9(%arg0: i32) -> (i32, i32) {
    %c0_i32 = arith.constant 0 : i32
    %c0_i32_0 = arith.constant 0 : i32
    %c0_i32_1 = arith.constant 0 : i32
    return %c0_i32, %c0_i32_0 : i32, i32
  }
  func.func @transform_10(%arg0: i32) -> (i32, i32) {
    %c0_i32 = arith.constant 0 : i32
    %c0_i32_0 = arith.constant 0 : i32
    %c0_i32_1 = arith.constant 0 : i32
    return %c0_i32, %c0_i32_0 : i32, i32
  }
  func.func @transform_11(%arg0: i32) -> (i32, i32, i32) {
    %c0_i32 = arith.constant 0 : i32
    %c0_i32_0 = arith.constant 0 : i32
    %c0_i32_1 = arith.constant 0 : i32
    return %arg0, %c0_i32, %c0_i32_0 : i32, i32, i32
  }
}

</mosaic_0001>

<bundles_post_ra>
// kernel: sound_classifier_forward.1
= control target key start
LH: loop header
LB: loop body
LE: loop exit
PB: predicated region body
PF: predicated region fallthrough
CT: control target
= control target key end

     0   :  { %16 = vsyncpa [#allocation7], 0  ;;  %s2324_s0 = inlined_call_operand.vmem [shape: f32[2,1,64], index: 0, kind: input, shape index: {}]   ;;  %s2325_s1 = inlined_call_operand.vmem [shape: f32[3,16,1], index: 1, kind: input, shape index: {}]   ;;  %s2326_s2 = inlined_call_operand.vmem [shape: f32[16,1], index: 2, kind: input, shape index: {}]   ;;  %s2327_s3 = inlined_call_operand.vmem [shape: bf16[48,32], index: 3, kind: input, shape index: {}]   ;;  %s2328_s4 = inlined_call_operand.vmem [shape: f32[1,32], index: 4, kind: input, shape index: {}]   ;;  %s2329_s5 = inlined_call_operand.vmem [shape: bf16[96,64], index: 5, kind: input, shape index: {}]   ;;  %s2330_s6 = inlined_call_operand.vmem [shape: f32[1,64], index: 6, kind: input, shape index: {}]   ;;  %s2331_s7 = inlined_call_operand.vmem [shape: bf16[512,128], index: 7, kind: input, shape index: {}]   ;;  %s2332_s8 = inlined_call_operand.vmem [shape: f32[1,128], index: 8, kind: input, shape index: {}]   ;;  %s2333_s9 = inlined_call_operand.vmem [shape: bf16[128,128], index: 9, kind: input, shape index: {}]   ;;  %s2334_s10 = inlined_call_operand.vmem [shape: f32[1,128], index: 10, kind: input, shape index: {}]   ;;  %s2335_s11 = inlined_call_operand.hbm [shape: f32[2,1,128], index: 11, kind: output, shape index: {}]  }
   0x1   :  { %18 = vsyncpa [#allocation7 + $0x1], 0  ;;  %s1946_s17 = smov 0   ;;  %s1948_s18 = smov 0  }
   0x2   :  { %s1950_s19 = smov 0   ;;  %s1952_s20 = smov 0  }
   0x3 LB: > { %2339 = sst [smem:[#allocation9_spill]] %s1870_s19  ;;  %s1967_s21 = sadd.s32 4294967295, %s1874_s20   ;;  %s1874_s20 = sphi %s1952_s20, %s2350_s20   ;;  %s1870_s19 = sphi %s1950_s19, %s2347_s19   ;;  %s1866_s18 = sphi %s1948_s18, %s2349_s18   ;;  %s1862_s17 = sphi %s1946_s17, %s2348_s17  }
   0x4   : > { %s1512_s22 = sadd.s32 4294967294, %s1874_s20   ;;  %s1971_s23 = sadd.s32 1, %s1874_s20  }
   0x5   : > { %s267_s24 = sadd.s32 1, %s1870_s19  ;;  %s264_s25 = ssub.s32 %s1874_s20, %s1971_s23 }
   0x6   : > { %p277_p0 = scmp.ne.s32.totalorder %s1870_s19, %s1866_s18  ;;  %p265_p1 = scmp.eq.s32.totalorder %s264_s25, 0 }
   0x7   : > { %p278_p2 = scmp.eq.s32.totalorder %s1967_s21, 1  ;;  %p283_p3 = scmp.ne.s32.totalorder %s1866_s18, %s1862_s17 }
   0x8   : > { %p284_p4 = scmp.eq.s32.totalorder %s1512_s22, 1  ;;  %p1515_p7 = scmp.ge.s32.totalorder %s1874_s20, 1 }
   0x9   : > { %s1982_s26 = scalar_select %p265_p1, %s1870_s19, %s267_s24  }
   0xa   : > { %p1984_p5 = por %p278_p2, %p277_p0  ;;  %p1988_p6 = por %p284_p4, %p283_p3 }
   0xb   : > { %2340 = sst [smem:[#allocation10_spill]] %s1982_s26  ;;  %p338_p8 = scmp.lt.s32.totalorder %s1874_s20, 3 }
   0xd   : > { %p339_p9 = pnand %p1515_p7, %p338_p8 }
   0xe   : > { %p375_p10 = scmp.lt.s32.totalorder (!%p339_p9), %s1967_s21, 1  ;;  %s1877_s26 = smov (!%p339_p9), 1  }
   0xf   : > { %342 = sbr.rel (%p339_p9) target bundleno = 1558 (0x616), region = 64  ;;  %s1880_s29 = smov (!%p339_p9), 16  }
  0x10   : > { %s1881_s30 = smov (!%p339_p9), 32   ;;  %s2345_s12 = smov (!%p339_p9), 64  }
  0x11   : > { %s373_s19 = sand.u32 (!%p339_p9), 1, %s1866_s18   ;;  %s1571_s13 = sshll.u32 (!%p339_p9), %s1967_s21, 4 }
  0x12   : > { %s1448_s22 = scalar_lea.sflag (!%p339_p9), [#allocation7], %s373_s19 }
  0x14   : > { %v396_v0 = vld [vmem:[%s2325_s1 + $0x8] sm:$0xff]  ;;  %v395_v1 = vld [vmem:[%s2325_s1] sm:$0xff]  ;;  %v1876_v2 = vmov 0   ;;  %v397_v3 = vld [vmem:[%s2325_s1 + $0x10] sm:$0xff]  ;;  %s376_s16 = scalar_select %p375_p10, %s1967_s21, 1  ;;  %v401_v10 = vlaneseq  ;;  %vm388_vm0 = vcmask 7168  }
  0x15   : > { %1734 = vset.pattern.permute.xlu1 %v1876_v2  ;;  %1733 = vset.pattern.permute.xlu0 %v1876_v2  ;;  %v398_v5 = vld [vmem:[%s2325_s1 + $0x18] sm:$0xff]  ;;  %v399_v6 = vld [vmem:[%s2325_s1 + $0x20] sm:$0xff]  ;;  %v400_v7 = vld [vmem:[%s2325_s1 + $0x28] sm:$0xff]  ;;  %vm393_vm1 = vcmask 515072   ;;  %vm507_vm2 = vcmask 123904   ;;  %v1879_v40 = vmov 0.0  }
  0x16   : > { %412 = vperm.xlu1 %1734, %v396_v0   ;;  %407 = vperm.xlu0 %1733, %v395_v1   ;;  %s377_s25 = scalar_lea.vmem %s2324_s0, %s376_s16  ;;  %v450_v8 = vld [vmem:[%s2326_s2] sm:$0xff]  ;;  %v451_v9 = vld [vmem:[%s2326_s2 + $0x8] sm:$0xff]  ;;  %v2024_v13 = vshrl.u32 %v401_v10, 7  ;;  %508 = vst.msk [vmem:[#allocation2] sm:$0x3] %vm507_vm2, %v1879_v40  ;;  %vm498_vm3 = vcmask 130048   ;;  %s2283_s16 = scalar_lea.hbm %s2335_s11, %s1571_s13 }
  0x17   : > { %v1516_v4 = vld [vmem:[%s377_s25] ss:$0 sm:$0xff]  ;;  %s1878_s25 = smov 127   ;;  %509 = vst.msk [vmem:[#allocation2 + $0x42] sm:$0x3] %vm507_vm2, %v1879_v40  ;;  %v1765_v54 = vld [vmem:[%s2327_s3 + $0x10] sm:$0xff]  }
  0x18   : > { %v2027_v15 = vsub.s32 0, %v2024_v13  ;;  %1639 = vmatprep.subr.bf16.mxu1 %v1765_v54  ;;  %v1766_v1 = vld [vmem:[%s2327_s3 + $0x8] sm:$0xff]   ;;  %v1767_v2 = vld [vmem:[%s2327_s3] sm:$0xff]   ;;  %vm605_vm4 = vcmask 261120   ;;  %vm643_vm5 = vcmask 392192   ;;  %vm707_vm6 = vcmask 254976  }
  0x19   : > { %1640 = vmatpush3.bf16.msra.mxu1 %v1765_v54  ;;  %708 = vst.msk [vmem:[#allocation3] sm:$0x3] %vm707_vm6, %v1879_v40  ;;  %709 = vst.msk [vmem:[#allocation3 + $0x22] sm:$0x3] %vm707_vm6, %v1879_v40  ;;  %vm1882_vm7 = vmmov 0   ;;  %vm757_vm8 = vcmask 523264  }
  0x1a   : > { %420 = vperm.xlu0 %1733, %v397_v3   ;;  %385 = vrot.lane.b32.xlu1 %v1516_v4, %s1877_s26  ;;  %vm816_vm9 = vcmask 785408   ;;  %vm2169_vm10 = vcmp.lt.s32.totalorder %v401_v10, 64  ;;  %vm894_vm11 = vcmp.ge.s32.totalorder %v401_v10, 64  ;;  %vm895_vm12 = vcmp.lt.s32.totalorder %v401_v10, 128  ;;  %s1885_s21 = smov [#allocation6]  }
  0x1b   : > { %1641 = vmatprep.subr.bf16.mxu1 %v1766_v1  ;;  %vm896_vm13 = vmand %vm894_vm11, %vm895_vm12 }
  0x1d   : > { %1642 = vmatpush3.bf16.msra.mxu1 %v1766_v1 }
  0x1e   : > { %425 = vperm.xlu0 %1733, %v398_v5   ;;  %438 = vperm.xlu1 %1734, %v399_v6  }
  0x1f   : > { %1643 = vmatprep.subr.bf16.mxu1 %v1767_v2 }
  0x21   : > { %1644 = vmatpush3.bf16.msra.mxu1 %v1767_v2 }
  0x22   : > { %390 = vrot.lane.b32.xlu0 %v1516_v4, %s1878_s25  ;;  %443 = vperm.xlu1 %1734, %v400_v7   ;;  %s2337_s25 = smov 64  }
  0x23   : > { %1649 = vmatprep.subr.bf16.mxu1 %v1879_v40 }
  0x26   : > { %454 = vperm.xlu0 %1733, %v450_v8   ;;  %459 = vperm.xlu1 %1734, %v451_v9  }
  0x91   : > { %v413_v11 = vpop.permute.xlu1 %412  ;;  %v408_v12 = vpop.permute.xlu0 %407 }
  0x95   : > { %v421_v14 = vpop.permute.xlu0 %420  ;;  %v386_v16 = vpop.permute.xlu1 %385 }
  0x96   : > { %v389_v17 = vsel %vm388_vm0, 0.0, %v386_v16  ;;  %v428_v26 = vmul.f32 %v1516_v4, %v421_v14 }
  0x97   : > { %v404_v18 = vrot.slane %v389_v17, %v2027_v15 }
  0x99   : > { %v426_v19 = vpop.permute.xlu0 %425  ;;  %v439_v20 = vpop.permute.xlu1 %438  ;;  %v415_v21 = vmul.f32 %v408_v12, %v404_v18  ;;  %v416_v22 = vmul.f32 %v413_v11, %v404_v18 }
  0x9a   : > { %v429_v23 = vmul.f32 %v1516_v4, %v426_v19 }
  0x9b   : > { %v430_v32 = vadd.f32 %v428_v26, %v415_v21 }
  0x9c   : > { %v431_v29 = vadd.f32 %v429_v23, %v416_v22 }
  0x9d   : > { %v391_v24 = vpop.permute.xlu0 %390  ;;  %v444_v28 = vpop.permute.xlu1 %443 }
  0x9e   : > { %v394_v25 = vsel %vm393_vm1, %v391_v24, 0.0 }
  0x9f   : > { %v435_v27 = vrot.slane %v394_v25, %v2027_v15 }
  0xa1   : > { %v446_v30 = vmul.f32 %v439_v20, %v435_v27  ;;  %v447_v31 = vmul.f32 %v444_v28, %v435_v27  ;;  %v455_v35 = vpop.permute.xlu0 %454  ;;  %v460_v37 = vpop.permute.xlu1 %459 }
  0xa3   : > { %v448_v33 = vadd.f32 %v446_v30, %v430_v32  ;;  %v449_v34 = vadd.f32 %v447_v31, %v431_v29 }
  0xa5   : > { %v462_v36 = vadd.f32 %v455_v35, %v448_v33  ;;  %v463_v39 = vadd.f32 %v460_v37, %v449_v34 }
  0xa7   : > { %v464_v38 = vmax.f32 %v462_v36, 0.0  ;;  %v465_v41 = vmax.f32 %v463_v39, 0.0 }
  0xa9   : > { %466 = vxpose.xlu0.b32.start [1/2] (short) (narrow) %v464_v38, 64 }
  0xad   : > { %467 = vxpose.xlu0.b32.end [2/2] (short) (narrow) %v465_v41, 64 }
 0x125   : > { %v482_v42 = vpop.trf.xlu0 }
 0x126   : > { %499 = vst.msk [vmem:[#allocation2 + $0x2] sm:$0xff] %vm498_vm3, %v482_v42 }
 0x129   : > { %v483_v43 = vpop.trf.xlu0 }
 0x12a   : > { %500 = vst.msk [vmem:[#allocation2 + $0xa] sm:$0xff] %vm498_vm3, %v483_v43 }
 0x12d   : > { %v484_v44 = vpop.trf.xlu0 }
 0x12e   : > { %501 = vst.msk [vmem:[#allocation2 + $0x12] sm:$0xff] %vm498_vm3, %v484_v44 }
 0x131   : > { %v485_v45 = vpop.trf.xlu0  ;;  %v530_v47 = vld [vmem:[#allocation2 + $0x2] ss:$2 sm:$0xff]  ;;  %v538_v48 = vld [vmem:[#allocation2 + $0x3] ss:$2 sm:$0xff] }
 0x132   : > { %502 = vst.msk [vmem:[#allocation2 + $0x1a] sm:$0xff] %vm498_vm3, %v485_v45  ;;  %v545_v52 = vmax.f32 %v530_v47, %v538_v48  ;;  %v510_v21 = vld [vmem:[#allocation2] ss:$2 sm:$0xff]  ;;  %v518_v23 = vld [vmem:[#allocation2 + $0x1] ss:$2 sm:$0xff] }
 0x133   : > { %v525_v28 = vmax.f32 %v510_v21, %v518_v23 }
 0x135   : > { %v486_v46 = vpop.trf.xlu0  ;;  %v550_v55 = vld [vmem:[#allocation2 + $0x4] ss:$2 sm:$0xff]  ;;  %v558_v56 = vld [vmem:[#allocation2 + $0x5] ss:$2 sm:$0xff] }
 0x136   : > { %503 = vst.msk [vmem:[#allocation2 + $0x22] sm:$0xff] %vm498_vm3, %v486_v46  ;;  %v565_v61 = vmax.f32 %v550_v55, %v558_v56  ;;  %v1768_v55 = vld [vmem:[%s2329_s5 + $0x28] sm:$0xff]   ;;  %v1769_v56 = vld [vmem:[%s2329_s5 + $0x20] sm:$0xff]  }
 0x139   : > { %v487_v49 = vpop.trf.xlu0  ;;  %v532_v50 = vld [vmem:[#allocation2 + $0x12] ss:$2 sm:$0xff]  ;;  %v540_v51 = vld [vmem:[#allocation2 + $0x13] ss:$2 sm:$0xff] }
 0x13a   : > { %504 = vst.msk [vmem:[#allocation2 + $0x2a] sm:$0xff] %vm498_vm3, %v487_v49  ;;  %v546_v53 = vmax.f32 %v532_v50, %v540_v51  ;;  %v512_v22 = vld [vmem:[#allocation2 + $0x10] ss:$2 sm:$0xff]  ;;  %v520_v24 = vld [vmem:[#allocation2 + $0x11] ss:$2 sm:$0xff] }
 0x13b   : > { %v526_v29 = vmax.f32 %v512_v22, %v520_v24 }
 0x13c   : > { %v1735_v57 = vpack.i.bf16 %v546_v53, %v545_v52 }
 0x13d   : > { %v488_v58 = vpop.trf.xlu0  ;;  %v552_v59 = vld [vmem:[#allocation2 + $0x14] ss:$2 sm:$0xff]  ;;  %v560_v60 = vld [vmem:[#allocation2 + $0x15] ss:$2 sm:$0xff] }
 0x13e   : > { %505 = vst.msk [vmem:[#allocation2 + $0x32] sm:$0xff] %vm498_vm3, %v488_v58  ;;  %1736 = vrot.lane.b32.xlu1 %v1735_v57, %s1880_s29  ;;  %v566_v62 = vmax.f32 %v552_v59, %v560_v60  ;;  %v1770_v57 = vld [vmem:[%s2329_s5 + $0x18] sm:$0xff]   ;;  %v1771_v58 = vld [vmem:[%s2329_s5 + $0x10] sm:$0xff]   ;;  %v1517_v59 = vld [vmem:[%s2328_s4] ss:$0 sm:$0xff] }
 0x140   : > { %v1740_v63 = vpack.i.bf16 %v566_v62, %v565_v61 }
 0x141   : > { %v489_v0 = vpop.trf.xlu0  ;;  %v534_v3 = vld [vmem:[#allocation2 + $0x22] ss:$2 sm:$0xff]  ;;  %v542_v4 = vld [vmem:[#allocation2 + $0x23] ss:$2 sm:$0xff] }
 0x142   : > { %506 = vst.msk [vmem:[#allocation2 + $0x3a] sm:$0xff] %vm498_vm3, %v489_v0  ;;  %1741 = vrot.lane.b32.xlu1 %v1740_v63, %s1881_s30  ;;  %v547_v8 = vmax.f32 %v534_v3, %v542_v4  ;;  %v514_v37 = vld [vmem:[#allocation2 + $0x20] ss:$2 sm:$0xff]  ;;  %v522_v39 = vld [vmem:[#allocation2 + $0x21] ss:$2 sm:$0xff] }
 0x143   : > { %v527_v45 = vmax.f32 %v514_v37, %v522_v39 }
 0x145   : > { %v554_v12 = vld [vmem:[#allocation2 + $0x24] ss:$2 sm:$0xff]  ;;  %v562_v14 = vld [vmem:[#allocation2 + $0x25] ss:$2 sm:$0xff] }
 0x146   : > { %v567_v18 = vmax.f32 %v554_v12, %v562_v14  ;;  %v1773_v12 = vld [vmem:[%s2329_s5] sm:$0xff]  }
 0x149   : > { %v536_v5 = vld [vmem:[#allocation2 + $0x32] ss:$2 sm:$0xff]  ;;  %v544_v6 = vld [vmem:[#allocation2 + $0x33] ss:$2 sm:$0xff] }
 0x14a   : > { %v556_v7 = vld [vmem:[#allocation2 + $0x34] ss:$2 sm:$0xff]  ;;  %v548_v9 = vmax.f32 %v536_v5, %v544_v6  ;;  %v564_v11 = vld [vmem:[#allocation2 + $0x35] ss:$2 sm:$0xff] }
 0x14b   : > { %v568_v17 = vmax.f32 %v556_v7, %v564_v11  ;;  %v516_v41 = vld [vmem:[#allocation2 + $0x30] ss:$2 sm:$0xff]  ;;  %v524_v42 = vld [vmem:[#allocation2 + $0x31] ss:$2 sm:$0xff] }
 0x14c   : > { %v1745_v16 = vpack.i.bf16 %v548_v9, %v547_v8  ;;  %v528_v46 = vmax.f32 %v516_v41, %v524_v42  ;;  %v1772_v8 = vld [vmem:[%s2329_s5 + $0x8] sm:$0xff]  }
 0x14d   : > { %v1750_v19 = vpack.i.bf16 %v568_v17, %v567_v18 }
 0x14e   : > { %1746 = vrot.lane.b32.xlu1 %v1745_v16, %s1880_s29 }
 0x152   : > { %1751 = vrot.lane.b32.xlu1 %v1750_v19, %s1881_s30 }
 0x1b0   : > { %v1737_v20 = vpop.permute.xlu1 %1736 }
 0x1b1   : > { %v1739_v25 = vunpack.i.h.bf16 %v1737_v20  ;;  %v1738_v26 = vunpack.i.l.bf16 %v1737_v20 }
 0x1b3   : > { %v601_v32 = vsel %vm498_vm3, %v525_v28, %v1738_v26  ;;  %v602_v33 = vsel %vm498_vm3, %v526_v29, %v1739_v25 }
 0x1b4   : > { %v1742_v27 = vpop.permute.xlu1 %1741 }
 0x1b5   : > { %v1744_v30 = vunpack.i.h.bf16 %v1742_v27  ;;  %v1743_v31 = vunpack.i.l.bf16 %v1742_v27 }
 0x1b7   : > { %v606_v34 = vsel %vm605_vm4, %v601_v32, %v1743_v31  ;;  %v607_v35 = vsel %vm605_vm4, %v602_v33, %v1744_v30 }
 0x1b8   : > { %v610_v36 = vpack.c.bf16 %v607_v35, %v606_v34 }
 0x1ba   : > { %1645 = vmatprep.mubr.msk.bf16.mxu1 %vm643_vm5, %v610_v36 }
 0x1c0   : > { %v1747_v38 = vpop.permute.xlu1 %1746 }
 0x1c1   : > { %v1749_v43 = vunpack.i.h.bf16 %v1747_v38  ;;  %v1748_v44 = vunpack.i.l.bf16 %v1747_v38 }
 0x1c3   : > { %v603_v50 = vsel %vm498_vm3, %v527_v45, %v1748_v44  ;;  %v604_v51 = vsel %vm498_vm3, %v528_v46, %v1749_v43  ;;  %v1774_v45 = vld [vmem:[%s2331_s7 + $0x78] sm:$0xff]  }
 0x1c4   : > { %v1752_v47 = vpop.permute.xlu1 %1751  ;;  %v1775_v46 = vld [vmem:[%s2331_s7 + $0xf8] sm:$0xff]   ;;  %1586 = vmatprep.subr.bf16.mxu0 %v1774_v45 }
 0x1c5   : > { %v1754_v48 = vunpack.i.h.bf16 %v1752_v47  ;;  %v1753_v49 = vunpack.i.l.bf16 %v1752_v47  ;;  %v1776_v47 = vld [vmem:[%s2331_s7 + $0x38] sm:$0xff]  }
 0x1c6   : > { %1587 = vmatpush3.bf16.msra.mxu0 %v1776_v47 }
 0x1c7   : > { %v608_v52 = vsel %vm605_vm4, %v603_v50, %v1753_v49  ;;  %v609_v53 = vsel %vm605_vm4, %v604_v51, %v1754_v48  ;;  %v1777_v48 = vld [vmem:[%s2331_s7 + $0xb8] sm:$0xff]   ;;  %v1778_v49 = vld [vmem:[%s2331_s7 + $0x70] sm:$0xff]  }
 0x1c8   : > { %v611_v54 = vpack.c.bf16 %v609_v53, %v608_v52  ;;  %v1779_v50 = vld [vmem:[%s2331_s7 + $0xf0] sm:$0xff]   ;;  %1588 = vmatprep.subr.bf16.mxu0 %v1778_v49  ;;  %v1782_v53 = vld [vmem:[%s2331_s7 + $0x68] sm:$0xff]  }
 0x1c9   : > { %v1780_v51 = vld [vmem:[%s2331_s7 + $0x30] sm:$0xff]   ;;  %v1798_v49 = vld [vmem:[%s2331_s7 + $0x48] sm:$0xff]  }
 0x1ca   : > { %1646 = vmatmul.mubr.msk.bf16.vlgmr.msra.gmra.mxu1 %vm643_vm5, %v611_v54  ;;  %v1781_v52 = vld [vmem:[%s2331_s7 + $0xb0] sm:$0xff]   ;;  %v1783_v54 = vld [vmem:[%s2331_s7 + $0xe8] sm:$0xff]   ;;  %1589 = vmatpush3.bf16.msra.mxu0 %v1780_v51 }
 0x1cb   : > { %1650 = vmatpush3.bf16.msra.mxu1 %v1768_v55  ;;  %1661 = vmatprep.mubr.msk.bf16.mxu1 %vm1882_vm7, %v1879_v40  ;;  %v1784_v55 = vld [vmem:[%s2331_s7 + $0x28] sm:$0xff]  }
 0x1cc   : > { %1651 = vmatprep.subr.bf16.mxu1 %v1879_v40  ;;  %1590 = vmatprep.subr.bf16.mxu0 %v1782_v53  ;;  %v1800_v53 = vld [vmem:[%s2331_s7 + $0x8] sm:$0xff]  }
 0x1ce   : > { %1591 = vmatpush3.bf16.msra.mxu0 %v1784_v55  ;;  %v1802_v55 = vld [vmem:[%s2331_s7 + $0x40] sm:$0xff]  }
 0x1cf   : > { %1652 = vmatpush3.bf16.msra.mxu1 %v1769_v56  ;;  %v1785_v56 = vld [vmem:[%s2331_s7 + $0xa8] sm:$0xff]  }
 0x1d0   : > { %1653 = vmatprep.subr.bf16.mxu1 %v1879_v40 }
 0x1d3   : > { %1654 = vmatpush3.bf16.msra.mxu1 %v1770_v57  ;;  %v1523_v57 = vld [vmem:[%s2330_s6] ss:$0 sm:$0xff] }
 0x1d4   : > { %1655 = vmatprep.subr.bf16.mxu1 %v1879_v40 }
 0x1d7   : > { %1656 = vmatpush3.bf16.msra.mxu1 %v1771_v58 }
 0x1d8   : > { %1657 = vmatprep.subr.bf16.mxu1 %v1879_v40 }
 0x1db   : > { %1658 = vmatpush3.bf16.msra.mxu1 %v1772_v8  ;;  %v1789_v8 = vld [vmem:[%s2331_s7 + $0xa0] sm:$0xff]  }
 0x1dc   : > { %1659 = vmatprep.subr.bf16.mxu1 %v1879_v40 }
 0x1df   : > { %1660 = vmatpush3.bf16.msra.mxu1 %v1773_v12  ;;  %v1792_v12 = vld [vmem:[%s2331_s7 + $0x18] sm:$0xff]  }
 0x1e0   : > { %1608 = vmatprep.subr.bf16.mxu1 %v1775_v46 }
 0x28a   : > { %v1647_v60 = vpop.f32.mrf.mxu1 }
 0x28b   : > { %v693_v61 = vadd.f32 %v1647_v60, %v1517_v59 }
 0x28c   : > { %v684_v62 = vpop.f32.mrf.mxu1 }
 0x28d   : > { %v701_v63 = vmax.f32 %v693_v61, 0.0  ;;  %v685_v0 = vadd.f32 %v1517_v59, %v684_v62  ;;  %v1884_v61 = vmov 1966171168  }
 0x28e   : > { %v1648_v1 = vpop.f32.mrf.mxu1  ;;  %v878_v62 = vunpack.c.l.s4 %v1884_v61  ;;  %v1805_v61 = vld [vmem:[%s2331_s7 + $0x80] sm:$0xff]  }
 0x28f   : > { %705 = vst.msk [vmem:[#allocation3 + $0x12] sm:$0xff] %vm605_vm4, %v701_v63  ;;  %v699_v2 = vmax.f32 %v685_v0, 0.0  ;;  %v696_v3 = vadd.f32 %v1648_v1, %v1517_v59 }
 0x290   : > { %v687_v4 = vpop.f32.mrf.mxu1 }
 0x291   : > { %703 = vst.msk [vmem:[#allocation3 + $0x2] sm:$0xff] %vm605_vm4, %v699_v2  ;;  %v702_v5 = vmax.f32 %v696_v3, 0.0  ;;  %v688_v6 = vadd.f32 %v1517_v59, %v687_v4  ;;  %v1786_v3 = vld [vmem:[%s2331_s7 + $0x60] sm:$0xff]  }
 0x292   : > { %v1787_v4 = vld [vmem:[%s2331_s7 + $0xe0] sm:$0xff]   ;;  %1592 = vmatprep.subr.bf16.mxu0 %v1786_v3  ;;  %v984_v3 = vsub.s32 1, %v2024_v13 }
 0x293   : > { %706 = vst.msk [vmem:[#allocation3 + $0x1a] sm:$0xff] %vm605_vm4, %v702_v5  ;;  %v700_v7 = vmax.f32 %v688_v6, 0.0  ;;  %v1788_v5 = vld [vmem:[%s2331_s7 + $0x20] sm:$0xff]   ;;  %v879_v6 = vunpack.c.0.s8 %v878_v62 }
 0x294   : > { %1593 = vmatpush3.bf16.msra.mxu0 %v1788_v5  ;;  %v988_v5 = vsub.s32 2, %v2024_v13 }
 0x295   : > { %704 = vst.msk [vmem:[#allocation3 + $0xa] sm:$0xff] %vm605_vm4, %v700_v7 }
 0x29a   : > { %v722_v9 = vld [vmem:[#allocation3 + $0x12] ss:$2 sm:$0xff]  ;;  %v726_v11 = vld [vmem:[#allocation3 + $0x13] ss:$2 sm:$0xff] }
 0x29b   : > { %v728_v19 = vmax.f32 %v722_v9, %v726_v11  ;;  %v732_v21 = vld [vmem:[#allocation3 + $0x14] ss:$2 sm:$0xff]  ;;  %v736_v22 = vld [vmem:[#allocation3 + $0x15] ss:$2 sm:$0xff] }
 0x29c   : > { %v720_v14 = vld [vmem:[#allocation3 + $0x2] ss:$2 sm:$0xff]  ;;  %v724_v16 = vld [vmem:[#allocation3 + $0x3] ss:$2 sm:$0xff]  ;;  %v738_v25 = vmax.f32 %v732_v21, %v736_v22 }
 0x29d   : > { %v730_v17 = vld [vmem:[#allocation3 + $0x4] ss:$2 sm:$0xff]  ;;  %v727_v18 = vmax.f32 %v720_v14, %v724_v16  ;;  %v734_v20 = vld [vmem:[#allocation3 + $0x5] ss:$2 sm:$0xff]  ;;  %v2166_v14 = vsub.s32 %v879_v6, %v2024_v13 }
 0x29e   : > { %v737_v24 = vmax.f32 %v730_v17, %v734_v20  ;;  %v712_v27 = vld [vmem:[#allocation3 + $0x10] ss:$2 sm:$0xff]  ;;  %v716_v29 = vld [vmem:[#allocation3 + $0x11] ss:$2 sm:$0xff]  ;;  %v710_v30 = vld [vmem:[#allocation3] ss:$2 sm:$0xff] }
 0x29f   : > { %v1755_v23 = vpack.i.bf16 %v728_v19, %v727_v18  ;;  %v714_v31 = vld [vmem:[#allocation3 + $0x1] ss:$2 sm:$0xff]  ;;  %v718_v34 = vmax.f32 %v712_v27, %v716_v29  ;;  %v1790_v9 = vld [vmem:[%s2331_s7 + $0x58] sm:$0xff]  }
 0x2a0   : > { %v1760_v26 = vpack.i.bf16 %v738_v25, %v737_v24  ;;  %v717_v35 = vmax.f32 %v710_v30, %v714_v31  ;;  %v1791_v11 = vld [vmem:[%s2331_s7 + $0xd8] sm:$0xff]   ;;  %1594 = vmatprep.subr.bf16.mxu0 %v1790_v9  ;;  %v1794_v29 = vld [vmem:[%s2331_s7 + $0x50] sm:$0xff]  }
 0x2a1   : > { %1756 = vrot.lane.b32.xlu1 %v1755_v23, %s1881_s30  ;;  %v1793_v17 = vld [vmem:[%s2331_s7 + $0x98] sm:$0xff]   ;;  %1595 = vmatpush3.bf16.msra.mxu0 %v1792_v12  ;;  %s1818_s30 = sshll.u32 %s1885_s21, 4  ;;  %s1819_s30 = int_to_ptr.vmem [resolvable:$false] %s1818_s30 }
 0x2a2   : > { %1596 = vmatprep.subr.bf16.mxu0 %v1794_v29  ;;  %s1820_s26 = scalar_lea.vmem %s1819_s30, 32 }
 0x2a5   : > { %1761 = vrot.lane.b32.xlu1 %v1760_v26, %s2337_s25  ;;  %s374_s25 = scalar_lea.vmem [#allocation6], %s373_s19 }
 0x2a6   : > { %s1460_s14 = sshll.u32 %s374_s25, 4  ;;  %s2285_s14 = int_to_ptr.vmem [resolvable:$true] %s1460_s14 }
 0x2a7   : > { %s1814_s24 = scalar_lea.vmem %s2285_s14, 16  ;;  %p1821_p0 = scmp.lt.s32.totalorder %s2285_s14, %s1819_s30 }
 0x2a8   : > { %p1815_p11 = scmp.ne.s32.totalorder %s2285_s14, %s1814_s24  ;;  %p1822_p1 = scmp.lt.s32.totalorder %s1820_s26, %s1814_s24 }
 0x2aa   : > { %p1816_p12 = pnand %p1815_p11, %p1984_p5  ;;  %p1823_p2 = por %p1822_p1, %p1821_p0 }
 0x2ac   : > { %p1817_p13 = pneg %p1816_p12 }
 0x2ae   : > { %p1824_p3 = pnand %p1823_p2, %p1817_p13 }
 0x313   : > { %v1757_v28 = vpop.permute.xlu1 %1756 }
 0x314   : > { %v1759_v32 = vunpack.i.h.bf16 %v1757_v28  ;;  %v1758_v33 = vunpack.i.l.bf16 %v1757_v28 }
 0x316   : > { %v756_v39 = vsel %vm605_vm4, %v718_v34, %v1759_v32  ;;  %v755_v41 = vsel %vm605_vm4, %v717_v35, %v1758_v33  ;;  %v1795_v32 = vld [vmem:[%s2331_s7 + $0xd0] sm:$0xff]  }
 0x317   : > { %v1762_v36 = vpop.permute.xlu1 %1761  ;;  %v1796_v33 = vld [vmem:[%s2331_s7 + $0x10] sm:$0xff]  }
 0x318   : > { %v1764_v37 = vunpack.i.h.bf16 %v1762_v36  ;;  %v1763_v38 = vunpack.i.l.bf16 %v1762_v36  ;;  %v1797_v34 = vld [vmem:[%s2331_s7 + $0x90] sm:$0xff]   ;;  %1597 = vmatpush3.bf16.msra.mxu0 %v1796_v33 }
 0x319   : > { %1598 = vmatprep.subr.bf16.mxu0 %v1798_v49 }
 0x31a   : > { %v758_v42 = vsel %vm757_vm8, %v755_v41, %v1763_v38  ;;  %v759_v43 = vsel %vm757_vm8, %v756_v39, %v1764_v37 }
 0x31b   : > { %v760_v44 = vpack.c.bf16 %v759_v43, %v758_v42 }
 0x31c   : > { %1599 = vmatpush3.bf16.msra.mxu0 %v1800_v53 }
 0x31d   : > { %1662 = vmatmul.mubr.msk.bf16.vlgmr.msra.gmra.mxu1 %vm816_vm9, %v760_v44  ;;  %1600 = vmatprep.subr.bf16.mxu0 %v1802_v55 }
 0x31e   : > { %1609 = vmatpush3.bf16.msra.mxu1 %v1777_v48 }
 0x31f   : > { %1610 = vmatprep.subr.bf16.mxu1 %v1779_v50 }
 0x322   : > { %1611 = vmatpush3.bf16.msra.mxu1 %v1781_v52  ;;  %v1799_v52 = vld [vmem:[%s2331_s7 + $0xc8] sm:$0xff]  }
 0x323   : > { %1612 = vmatprep.subr.bf16.mxu1 %v1783_v54  ;;  %v1801_v54 = vld [vmem:[%s2331_s7 + $0x88] sm:$0xff]  }
 0x326   : > { %1613 = vmatpush3.bf16.msra.mxu1 %v1785_v56  ;;  %v1803_v56 = vld [vmem:[%s2331_s7 + $0xc0] sm:$0xff]  }
 0x327   : > { %1614 = vmatprep.subr.bf16.mxu1 %v1787_v4  ;;  %v992_v4 = vsub.s32 3, %v2024_v13  ;;  %v1807_v13 = vld [vmem:[%s2333_s9 + $0x30] sm:$0xff]  }
 0x32a   : > { %1615 = vmatpush3.bf16.msra.mxu1 %v1789_v8 }
 0x32b   : > { %1616 = vmatprep.subr.bf16.mxu1 %v1791_v11 }
 0x32e   : > { %1617 = vmatpush3.bf16.msra.mxu1 %v1793_v17  ;;  %v1806_v17 = vld [vmem:[%s2333_s9 + $0x38] sm:$0xff]  }
 0x32f   : > { %1618 = vmatprep.subr.bf16.mxu1 %v1795_v32 }
 0x332   : > { %1619 = vmatpush3.bf16.msra.mxu1 %v1797_v34 }
 0x333   : > { %1620 = vmatprep.subr.bf16.mxu1 %v1799_v52 }
 0x336   : > { %1621 = vmatpush3.bf16.msra.mxu1 %v1801_v54 }
 0x337   : > { %1622 = vmatprep.subr.bf16.mxu1 %v1803_v56 }
 0x33a   : > { %1623 = vmatpush3.bf16.msra.mxu1 %v1805_v61 }
 0x3dd   : > { %v854_v58 = vpop.f32.mrf.mxu1 }
 0x3de   : > { %v855_v59 = vadd.f32 %v1523_v57, %v854_v58 }
 0x3df   : > { %v1663_v60 = vpop.f32.mrf.mxu1 }
 0x3e0   : > { %v861_v63 = vmax.f32 %v855_v59, 0.0  ;;  %v1804_v60 = vld [vmem:[%s2331_s7] sm:$0xff]  }
 0x3e1   : > { %v857_v0 = vpop.f32.mrf.mxu1  ;;  %1601 = vmatpush3.bf16.msra.mxu0 %v1804_v60 }
 0x3e2   : > { %863 = vst.msk [vmem:[#allocation4] sm:$0xff] %vm757_vm8, %v861_v63  ;;  %v858_v1 = vadd.f32 %v1523_v57, %v857_v0  ;;  %1665 = vmatprep.subr.bf16.mxu0 %v1879_v40 }
 0x3e3   : > { %v1664_v2 = vpop.f32.mrf.mxu1 }
 0x3e4   : > { %v862_v7 = vmax.f32 %v858_v1, 0.0 }
 0x3e6   : > { %864 = vst.msk [vmem:[#allocation4 + $0x8] sm:$0xff] %vm757_vm8, %v862_v7 }
 0x3e9   : > { %v873_v18 = vld [vmem:[#allocation4 + $0x2] sm:$0x1]  ;;  %v874_v19 = vld [vmem:[#allocation4 + $0x3] sm:$0x1]  ;;  %v902_v20 = vld [vmem:[#allocation4 + $0x6] sm:$0x1] }
 0x3ea   : > { %v875_v21 = vmax.f32 %v873_v18, %v874_v19  ;;  %v903_v22 = vld [vmem:[#allocation4 + $0x7] sm:$0x1]  ;;  %v865_v23 = vld [vmem:[#allocation4] sm:$0x1]  ;;  %v866_v24 = vld [vmem:[#allocation4 + $0x1] sm:$0x1] }
 0x3eb   : > { %v904_v25 = vmax.f32 %v902_v20, %v903_v22  ;;  %v867_v26 = vmax.f32 %v865_v23, %v866_v24  ;;  %v898_v27 = vld [vmem:[#allocation4 + $0x4] sm:$0x1]  ;;  %v899_v28 = vld [vmem:[#allocation4 + $0x5] sm:$0x1]  ;;  %v1809_v18 = vld [vmem:[%s2333_s9 + $0x20] sm:$0xff]  }
 0x3ec   : > { %v883_v30 = vrot.slane %v875_v21, %v2166_v14  ;;  %v900_v31 = vmax.f32 %v898_v27, %v899_v28  ;;  %v1810_v19 = vld [vmem:[%s2333_s9 + $0x18] sm:$0xff]   ;;  %v1811_v20 = vld [vmem:[%s2333_s9 + $0x10] sm:$0xff]   ;;  %v1812_v21 = vld [vmem:[%s2333_s9 + $0x8] sm:$0xff]  }
 0x3ed   : > { %v954_v35 = vld [vmem:[#allocation4 + $0xe] sm:$0x1]  ;;  %v955_v36 = vld [vmem:[#allocation4 + $0xf] sm:$0x1]  ;;  %v928_v37 = vld [vmem:[#allocation4 + $0xa] sm:$0x1]  ;;  %v912_v39 = vrot.slane %v904_v25, %v2166_v14 }
 0x3ee   : > { %872 = vst.msk [vmem:[#allocation5] sm:$0x1] %vm2169_vm10, %v867_v26  ;;  %v890_v38 = vrot.slane %v883_v30, %v2166_v14  ;;  %v956_v41 = vmax.f32 %v954_v35, %v955_v36  ;;  %v929_v42 = vld [vmem:[#allocation4 + $0xb] sm:$0x1]  ;;  %901 = vst.msk [vmem:[#allocation5 + $0x1] sm:$0x1] %vm2169_vm10, %v900_v31 }
 0x3ef   : > { %v950_v43 = vld [vmem:[#allocation4 + $0xc] sm:$0x1]  ;;  %v951_v44 = vld [vmem:[#allocation4 + $0xd] sm:$0x1]  ;;  %v930_v45 = vmax.f32 %v928_v37, %v929_v42  ;;  %v924_v47 = vld [vmem:[#allocation4 + $0x8] sm:$0x1]  ;;  %v919_v57 = vrot.slane %v912_v39, %v2166_v14 }
 0x3f0   : > { %v952_v46 = vmax.f32 %v950_v43, %v951_v44  ;;  %v925_v48 = vld [vmem:[#allocation4 + $0x9] sm:$0x1]  ;;  %891 = vrot.lane.b32.xlu1 %v890_v38, %s2345_s12  ;;  %v964_v50 = vrot.slane %v956_v41, %v2166_v14  ;;  %v1813_v22 = vld [vmem:[%s2333_s9] sm:$0xff]  }
 0x3f1   : > { %v926_v51 = vmax.f32 %v924_v47, %v925_v48  ;;  %v938_v59 = vrot.slane %v930_v45, %v2166_v14  ;;  %v1066_v25 = vld [vmem:[%s2332_s8] sm:$0x1] }
 0x3f2   : > { %953 = vst.msk [vmem:[#allocation5 + $0x3] sm:$0x1] %vm2169_vm10, %v952_v46  ;;  %v971_v58 = vrot.slane %v964_v50, %v2166_v14  ;;  %v1357_v37 = vld [vmem:[%s2334_s10] sm:$0x1] }
 0x3f3   : > { %927 = vst.msk [vmem:[#allocation5 + $0x2] sm:$0x1] %vm2169_vm10, %v926_v51  ;;  %v945_v62 = vrot.slane %v938_v59, %v2166_v14 }
 0x3f4   : > { %920 = vrot.lane.b32.xlu1 %v919_v57, %s2345_s12  ;;  %972 = vrot.lane.b32.xlu0 %v971_v58, %s2345_s12 }
 0x3f8   : > { %946 = vrot.lane.b32.xlu1 %v945_v62, %s2345_s12 }
 0x462   : > { %v892_v63 = vpop.permute.xlu1 %891 }
 0x463   : > { %897 = vst.msk [vmem:[#allocation5] sm:$0x1] %vm896_vm13, %v892_v63 }
 0x466   : > { %v921_v0 = vpop.permute.xlu1 %920  ;;  %v973_v1 = vpop.permute.xlu0 %972 }
 0x467   : > { %923 = vst.msk [vmem:[#allocation5 + $0x1] sm:$0x1] %vm896_vm13, %v921_v0  ;;  %975 = vst.msk [vmem:[#allocation5 + $0x3] sm:$0x1] %vm896_vm13, %v973_v1 }
 0x46a   : > { %v947_v2 = vpop.permute.xlu1 %946 }
 0x46b   : > { %949 = vst.msk [vmem:[#allocation5 + $0x2] sm:$0x1] %vm896_vm13, %v947_v2 }
 0x472   : > { %v976_v6 = vld [vmem:[#allocation5] sm:$0xf] }
 0x473   : > { %v985_v7 = vrot.slane %v976_v6, %v984_v3  ;;  %v993_v8 = vrot.slane %v976_v6, %v992_v4  ;;  %v981_v10 = vrot.slane %v976_v6, %v2027_v15  ;;  %v989_v9 = vrot.slane %v976_v6, %v988_v5  ;;  %v1808_v15 = vld [vmem:[%s2333_s9 + $0x28] sm:$0xff]  }
 0x475   : > { %v999_v11 = vpack.c.bf16 %v985_v7, %v985_v7  ;;  %v1001_v12 = vpack.c.bf16 %v993_v8, %v993_v8  ;;  %v998_v14 = vpack.c.bf16 %v981_v10, %v981_v10  ;;  %v1000_v16 = vpack.c.bf16 %v989_v9, %v989_v9 }
 0x477   : > { %1291 = vmatprep.mubr.bf16.mxu0 %v999_v11  ;;  %1331 = vmatprep.mubr.bf16.mxu1 %v1001_v12 }
 0x478   : > { %1292 = vmatmul.mubr.bf16.vlgmr.msra.gmra.mxu0 %v998_v14  ;;  %1332 = vmatmul.mubr.bf16.vlgmr.msra.gmra.mxu1 %v1000_v16 }
 0x479   : > { %1666 = vmatpush3.bf16.msra.mxu0 %v1806_v17  ;;  %1681 = vmatprep.mubr.msk.bf16.mxu0 %vm1882_vm7, %v1879_v40 }
 0x47a   : > { %1667 = vmatprep.subr.bf16.mxu0 %v1879_v40 }
 0x47d   : > { %1668 = vmatpush3.bf16.msra.mxu0 %v1807_v13 }
 0x47e   : > { %1669 = vmatprep.subr.bf16.mxu0 %v1879_v40 }
 0x481   : > { %1670 = vmatpush3.bf16.msra.mxu0 %v1808_v15 }
 0x482   : > { %1671 = vmatprep.subr.bf16.mxu0 %v1879_v40 }
 0x485   : > { %1672 = vmatpush3.bf16.msra.mxu0 %v1809_v18 }
 0x486   : > { %1673 = vmatprep.subr.bf16.mxu0 %v1879_v40 }
 0x489   : > { %1674 = vmatpush3.bf16.msra.mxu0 %v1810_v19 }
 0x48a   : > { %1675 = vmatprep.subr.bf16.mxu0 %v1879_v40 }
 0x48d   : > { %1676 = vmatpush3.bf16.msra.mxu0 %v1811_v20 }
 0x48e   : > { %1677 = vmatprep.subr.bf16.mxu0 %v1879_v40 }
 0x491   : > { %1678 = vmatpush3.bf16.msra.mxu0 %v1812_v21 }
 0x492   : > { %1679 = vmatprep.subr.bf16.mxu0 %v1879_v40 }
 0x495   : > { %1680 = vmatpush3.bf16.msra.mxu0 %v1813_v22 }
 0x538   : > { %v1602_v23 = vpop.f32.mrf.mxu0  ;;  %v1624_v24 = vpop.f32.mrf.mxu1 }
 0x53a   : > { %v1603_v26 = vpop.f32.mrf.mxu0  ;;  %v1625_v27 = vpop.f32.mrf.mxu1 }
 0x53b   : > { %v1604_v28 = vadd.f32 %v1603_v26, %v1602_v23  ;;  %v1626_v40 = vadd.f32 %v1625_v27, %v1624_v24 }
 0x53c   : > { %v1605_v29 = vpop.f32.mrf.mxu0  ;;  %v1627_v30 = vpop.f32.mrf.mxu1 }
 0x53d   : > { %v1294_v31 = vadd.f32 %v1604_v28, %v1066_v25 }
 0x53e   : > { %v1606_v32 = vpop.f32.mrf.mxu0  ;;  %v1628_v33 = vpop.f32.mrf.mxu1 }
 0x53f   : > { %v1334_v34 = vadd.f32 %v1626_v40, %v1294_v31 }
 0x541   : > { %v1339_v35 = vmax.f32 %v1334_v34, 0.0 }
 0x543   : > { %v1340_v36 = vpack.c.bf16 %v1339_v35, %v1339_v35 }
 0x545   : > { %1682 = vmatmul.mubr.bf16.vlgmr.msra.gmra.mxu0 %v1340_v36 }
 0x605   : > { %v1440_v38 = vpop.f32.mrf.mxu0 }
 0x606   : > { %v1441_v39 = vadd.f32 %v1440_v38, %v1357_v37 }
 0x607   : > { %v1683_v41 = vpop.f32.mrf.mxu0 }
 0x608   : > { %1446 = vst [vmem:[%s374_s25] sm:$0x1] %v1441_v39 }
 0x609   : > { %v1443_v42 = vpop.f32.mrf.mxu0 }
 0x60a   : > { %1827 = shalt.err (!%p1824_p3)
}
 0x60b   : > { %s1828_s29 = scalar_lea.hbm %s2283_s16, 16  ;;  %s1832_s25 = scalar_lea.hbm %s2335_s11, 32 }
 0x60c   : > { %p1829_p4 = scmp.ne.s32.totalorder %s2283_s16, %s1828_s29  ;;  %p1833_p9 = scmp.lt.s32.totalorder %s2283_s16, %s2335_s11 }
 0x60d   : > { %p1834_p10 = scmp.lt.s32.totalorder %s1832_s25, %s1828_s29 }
 0x60e   : > { %p1830_p7 = pnand %p1829_p4, %p1984_p5 }
 0x60f   : > { %p1835_p11 = por %p1834_p10, %p1833_p9 }
 0x610   : > { %p1831_p8 = pneg %p1830_p7 }
 0x612   : > { %p1836_p12 = pnand %p1835_p11, %p1831_p8 }
 0x614   : > { %1839 = shalt.err (!%p1836_p12)
}
 0x615   : > { %1685 = dma.vmem_to_hbm [thread:$0]  (%p1984_p5), %s2285_s14, 16, %s2283_s16, %s1448_s22   ;;  %v1684_v43 = vpop.f32.mrf.mxu0 }
 0x616 PF: > { %p1691_p13 = scmp.ge.s32.totalorder %s1874_s20, 2  ;;  %s1472_s24 = sand.u32 1, %s1862_s17  }
 0x617   : > { %s1473_s21 = scalar_lea.sflag [#allocation7], %s1472_s24 }
 0x618   : > { %p1688_p0 = pnand %p1691_p13, %p1988_p6 }
 0x61a   : > { %p1689_p1 = pneg %p1688_p0 }
 0x61c   : > { %1857 = dma.done.wait (%p1689_p1), %s1473_s21, 16  }
 0x61d   : > { %1859 = vsyncadd (%p1689_p1), %s1473_s21, 4294967280  ;;  %s2346_s30 = sld [smem:[#allocation9_spill]]  ;;  %p21_p2 = scmp.ge.s32.totalorder %s1971_s23, 4  }
 0x61e   : > { %s2347_s19 = sld [smem:[#allocation10_spill]]  ;;  %s2348_s17 = smov %s1866_s18 }
 0x61f   : > { %s2350_s20 = smov %s1971_s23  ;;  %23 = sbr.rel (!%p21_p2) target bundleno = 3 (0x3), region = 133 }
 0x623   : > { %s2349_s18 = smov %s2346_s30 }
 0x624   :  { %1477 = vsyncpa [#allocation7], 1 }
 0x625   :  { %1479 = vsyncpa [#allocation7 + $0x1], 1 }

</bundles_post_ra>
